<compile_context>
chip_gen: v6e
topology: v6e:2x2x1
jax: 0.10.0
libtpu: 0.0.40
codegen_flags: <defaults>
</compile_context>

<pallas_src>
import functools

import jax
import jax.numpy as jnp
import numpy as np
from jax.experimental import pallas as pl
from jax.experimental.pallas import tpu as pltpu


def _bottleneck_kernel(pad, dilation,
                       x_ref, xt_ref, xb_ref, w1_ref, st1_ref, wdw_ref,
                       st2_ref, w3_ref, st3_ref, o_ref, y1s_ref):
    d = dilation
    _, TH, W, Cin = x_ref.shape
    TH2, Wp, Pp = y1s_ref.shape

    t = pl.program_id(1)
    is_first = t == 0
    is_last = t == pl.num_programs(1) - 1

    w1 = w1_ref[...]
    sh1, al1 = st1_ref[0, :], st1_ref[1, :]

    def conv1(xblk):
        # 1x1 pointwise on the MXU (bf16 in, f32 accumulate); BN scale is folded
        # into w1, only the per-channel shift + PReLU remain.
        rows = xblk.shape[0]
        y = jnp.dot(xblk.reshape(rows * W, Cin).astype(w1.dtype), w1,
                    preferred_element_type=jnp.float32)
        y = y + sh1
        y = jnp.where(y >= 0.0, y, al1 * y)                    # PReLU
        return y.reshape(rows, W, Pp)

    # ---- conv1 into the haloed scratch slab (separate core/halo matmuls; every
    # store starts at row/column 0 of a tile -> aligned). Halo rows are clamped
    # re-reads at the image border and zero-masked there (conv1 of an
    # out-of-image zero pixel is NOT zero because of the folded bias/BN shift).
    # TODO(synk): on v6e/v7x a bf16 y1 slab would halve its VMEM + read bytes.
    y1s_ref[pad:pad + TH, 0:W, :] = conv1(x_ref[0])
    y1s_ref[0:pad, 0:W, :] = jnp.where(is_first, 0.0, conv1(xt_ref[0]))
    y1s_ref[pad + TH:TH2, 0:W, :] = jnp.where(is_last, 0.0, conv1(xb_ref[0]))
    # Columns [W, Wp) implement the depthwise zero padding for the roll-based
    # kx taps below (true zeros, not conv1(0)).
    y1s_ref[:, W:Wp, :] = jnp.zeros((TH2, Wp - W, Pp), jnp.float32)

    # ---- conv2: depthwise 3x3 (dilated). 3 aligned row-strip reads; the kx taps
    # are XLU sublane rotates (pltpu.roll) instead of misaligned slices, and the
    # accumulator stays in vregs for the whole 9-tap MAC chain.
    wdw = wdw_ref[...]                                         # (9, Pp), hoisted
    acc = jnp.zeros((TH, Wp, Pp), jnp.float32)
    for ky in range(3):
        strip = y1s_ref[ky * d:ky * d + TH, :, :]              # (TH, Wp, Pp)
        # out[w] needs slab[w-d], slab[w], slab[w+d]; roll(x, s)[i] == x[i-s],
        # so kx=0 -> shift +d, kx=2 -> shift Wp-d (== -d, kept positive). The
        # wrapped elements land in the zero columns [W, Wp) or outside [0, W).
        acc = acc + pltpu.roll(strip, d, 1) * wdw[ky * 3 + 0]
        acc = acc + strip * wdw[ky * 3 + 1]
        acc = acc + pltpu.roll(strip, Wp - d, 1) * wdw[ky * 3 + 2]
    y2 = acc[:, 0:W, :] + st2_ref[0, :]
    y2 = jnp.where(y2 >= 0.0, y2, st2_ref[1, :] * y2)          # PReLU

    # ---- conv3: 1x1 pointwise (MXU) + BN shift (no activation) -----------------
    y3 = jnp.dot(y2.reshape(TH * W, Pp).astype(w3_ref.dtype), w3_ref[...],
                 preferred_element_type=jnp.float32)
    y3 = (y3 + st3_ref[0, :]).reshape(TH, W, Cin)

    # ---- residual add (aligned, unsliced core block) + final PReLU -------------
    out = y3 + x_ref[0]
    out = jnp.where(out >= 0.0, out, st3_ref[1, :] * out)
    o_ref[0] = out.astype(o_ref.dtype)


def _vmem_capacity_bytes():
    """Per-core VMEM capacity; falls back to the smallest current part (v7x, 64 MiB)."""
    try:
        return int(pltpu.get_tpu_info().vmem_capacity_bytes)
    except Exception:
        return 64 << 20


def _pick_tile_h(H, N, W, Wp, Cin, Pp, pad, budget_bytes):
    """Largest row tile that divides H, is a multiple of `pad`, and whose fully
    counted, double-buffered working set stays under budget_bytes. Prefers an
    even number of parallel grid steps (v7x runs 2 TensorCores)."""
    lane, sub = 128, 8
    rup = lambda v, m: ((v + m - 1) // m) * m
    cin_l = rup(Cin, lane)
    w_s = rup(W, sub)

    def footprint(th):
        th2 = th + 2 * pad
        x_blk = 2 * th * w_s * cin_l * 4                       # core (double-buffered)
        halo = 2 * 2 * pad * w_s * cin_l * 4                   # top + bottom halos
        out_blk = 2 * th * w_s * cin_l * 4                     # output block
        weights = 2 * (rup(Cin, sub) * Pp * 2 + Pp * cin_l * 2             # w1, w3 bf16
                       + (3 * rup(2, sub) + rup(9, sub)) * max(Pp, cin_l) * 4)
        slab = th2 * Wp * Pp * 4                               # y1 scratch (single)
        temps = 3 * th * Wp * Pp * 4 + th2 * w_s * Pp * 4      # acc/strip/y2 + conv1 out
        return x_blk + halo + out_blk + weights + slab + temps

    feasible = [c for c in range(pad, H + 1, pad)
                if H % c == 0 and footprint(c) <= budget_bytes]
    if not feasible:
        feasible = [pad]
    best = max(feasible)
    if (N * (H // best)) % 2 != 0:                             # keep both v7x TCs busy
        even = [c for c in feasible if (N * (H // c)) % 2 == 0 and 2 * c >= best]
        if even:
            best = max(even)
    return best


def bottleneck3x3_forward_nhwc(x, params, pad=1, dilation=1, tile_h=None,
                               matmul_dtype=jnp.bfloat16):
    """Fused Bottleneck3x3 forward on NHWC input (no wrapper-side HBM passes)."""
    # residual add requires output spatial == input spatial (as in PyTorch)
    assert pad == dilation, "residual add requires pad == dilation"
    d = dilation
    x = x.astype(jnp.float32)
    N, H, W, Cin = x.shape
    assert H % pad == 0, "H must be a multiple of pad (halo blocks are `pad` rows)"
    P = params["w1"].shape[1]
    lane = 128
    Pp = ((P + lane - 1) // lane) * lane    # lane-dense planes (free: vregs pad lanes anyway)
    Wp = ((W + d + 7) // 8) * 8             # slab width: >= W + d, 8-sublane aligned

    cap = _vmem_capacity_bytes()
    if tile_h is None:
        tile_h = _pick_tile_h(H, N, W, Wp, Cin, Pp, pad, budget_bytes=int(cap * 0.45))
    assert H % tile_h == 0 and tile_h % pad == 0, \
        "tile_h must divide H and be a multiple of pad"
    nT = H // tile_h
    bph = tile_h // pad                      # halo blocks (of `pad` rows) per tile
    n_hblk = H // pad                        # total halo blocks along H
    th2 = tile_h + 2 * pad

    # Fold BN scales (and conv bias / running mean) into the weights on the host
    # and zero-pad the planes dim to Pp (padded channels stay exactly zero).
    padP = lambda a: jnp.pad(a, [(0, 0)] * (a.ndim - 1) + [(0, Pp - P)])
    w1 = padP(params["w1"] * params["scale1"][None, :]).astype(matmul_dtype)    # (Cin,Pp)
    wdw = padP(params["wdw"] * params["scale2"][None, :])                        # (9,Pp) f32
    w3 = jnp.pad(params["w3"] * params["scale3"][None, :],
                 ((0, Pp - P), (0, 0))).astype(matmul_dtype)                     # (Pp,Cin)
    st1 = padP(jnp.stack([params["shift1"], params["alpha1"]]))                  # (2,Pp)
    st2 = padP(jnp.stack([params["shift2"], params["alpha2"]]))                  # (2,Pp)
    st3 = jnp.stack([params["shift3"], params["alpha_out"]])                     # (2,Cin)

    kernel = functools.partial(_bottleneck_kernel, pad, d)
    const = lambda shape: pl.BlockSpec(shape, lambda n, t: (0,) * len(shape))

    # TODO(synk): Cin < 128 makes the output stores lane-masked (vst.msk); padding
    # the in/out channel dim would change the interface, so it is left to callers.
    out = pl.pallas_call(
        kernel,
        out_shape=jax.ShapeDtypeStruct((N, H, W, Cin), jnp.float32),
        grid=(N, nT),
        in_specs=[
            # core rows of the tile (unpadded width)
            pl.BlockSpec((1, tile_h, W, Cin), lambda n, t: (n, t, 0, 0)),
            # `pad` halo rows above / below (clamped at the image border; the
            # out-of-image rows are zero-masked inside the kernel)
            pl.BlockSpec((1, pad, W, Cin),
                         lambda n, t: (n, jnp.maximum(t * bph - 1, 0), 0, 0)),
            pl.BlockSpec((1, pad, W, Cin),
                         lambda n, t: (n, jnp.minimum((t + 1) * bph, n_hblk - 1), 0, 0)),
            # constants (index_map never changes)
            const((Cin, Pp)),    # w1  (BN scale folded, bf16)
            const((2, Pp)),      # shift1 / alpha1
            const((9, Pp)),      # wdw (BN scale folded)
            const((2, Pp)),      # shift2 / alpha2
            const((Pp, Cin)),    # w3  (BN scale folded, bf16)
            const((2, Cin)),     # shift3 / alpha_out
        ],
        out_specs=pl.BlockSpec((1, tile_h, W, Cin), lambda n, t: (n, t, 0, 0)),
        scratch_shapes=[pltpu.VMEM((th2, Wp, Pp), jnp.float32)],
        compiler_params=pltpu.CompilerParams(
            dimension_semantics=("parallel", "parallel"),
            vmem_limit_bytes=min(int(cap * 3 // 4), 100 << 20)),
    )(x, x, x, w1, st1, wdw, st2, w3, st3)
    return out


def bottleneck3x3_forward(x_nchw, params, pad=1, dilation=1, tile_h=None,
                          matmul_dtype=jnp.bfloat16):
    """NCHW wrapper matching the PyTorch module interface."""
    # TODO(synk): channels-last callers should use bottleneck3x3_forward_nhwc
    # directly and skip these two transposes (each is an extra HBM pass).
    x = jnp.transpose(x_nchw, (0, 2, 3, 1))
    out = bottleneck3x3_forward_nhwc(x, params, pad=pad, dilation=dilation,
                                     tile_h=tile_h, matmul_dtype=matmul_dtype)
    return jnp.transpose(out, (0, 3, 1, 2))


def make_params(key, inplanes, planes):
    """Deterministic synthetic parameters matching the PyTorch module (eval-mode BN)."""
    eps = 1e-5
    keys = iter(jax.random.split(key, 32))

    def bn_fold(c):
        gamma = 1.0 + 0.1 * jax.random.normal(next(keys), (c,), jnp.float32)
        beta = 0.1 * jax.random.normal(next(keys), (c,), jnp.float32)
        mean = 0.1 * jax.random.normal(next(keys), (c,), jnp.float32)
        var = 0.5 + jax.random.uniform(next(keys), (c,), jnp.float32)
        bias = 0.1 * jax.random.normal(next(keys), (c,), jnp.float32)
        scale = gamma / jnp.sqrt(var + eps)
        shift = beta + (bias - mean) * scale
        return scale, shift

    prelu_init = 0.25  # PyTorch nn.PReLU default

    w1 = 0.3 * jax.random.normal(next(keys), (inplanes, planes), jnp.float32)
    s1, t1 = bn_fold(planes)
    wdw = 0.2 * jax.random.normal(next(keys), (9, planes), jnp.float32)  # (ky*3+kx, c)
    s2, t2 = bn_fold(planes)
    w3 = 0.3 * jax.random.normal(next(keys), (planes, inplanes), jnp.float32)
    s3, t3 = bn_fold(inplanes)

    return dict(
        w1=w1, scale1=s1, shift1=t1,
        alpha1=jnp.full((planes,), prelu_init, jnp.float32),
        wdw=wdw, scale2=s2, shift2=t2,
        alpha2=jnp.full((planes,), prelu_init, jnp.float32),
        w3=w3, scale3=s3, shift3=t3,
        alpha_out=jnp.full((inplanes,), prelu_init, jnp.float32),
    )


def ref_forward(x_nchw, params, pad=1, dilation=1):
    """Pure-JAX f32 reference (same math; lax conv for the depthwise stage)."""
    x = jnp.transpose(x_nchw, (0, 2, 3, 1)).astype(jnp.float32)
    P = params["w1"].shape[1]
    y = jnp.einsum("nhwc,cp->nhwp", x, params["w1"])
    y = y * params["scale1"] + params["shift1"]
    y = jnp.where(y >= 0, y, params["alpha1"] * y)
    dw = params["wdw"].reshape(3, 3, 1, P)                     # HWIO, I=1 depthwise
    y2 = jax.lax.conv_general_dilated(
        y, dw, window_strides=(1, 1),
        padding=((pad, pad), (pad, pad)),
        rhs_dilation=(dilation, dilation),
        dimension_numbers=("NHWC", "HWIO", "NHWC"),
        feature_group_count=P)
    y2 = y2 * params["scale2"] + params["shift2"]
    y2 = jnp.where(y2 >= 0, y2, params["alpha2"] * y2)
    y3 = jnp.einsum("nhwp,pc->nhwc", y2, params["w3"])
    y3 = y3 * params["scale3"] + params["shift3"]
    out = y3 + x
    out = jnp.where(out >= 0, out, params["alpha_out"] * out)
    return jnp.transpose(out, (0, 3, 1, 2))


if __name__ == "__main__":
    inplanes, planes = 4, 8
    N, H, W = 2, 16, 16

    key = jax.random.PRNGKey(0)
    kx, kp = jax.random.split(key)
    x = jax.random.normal(kx, (N, inplanes, H, W), jnp.float32)   # NCHW like PyTorch
    params = make_params(kp, inplanes, planes)

    ref = ref_forward(x, params, pad=1, dilation=1)

    # tile_h=8 -> grid (2, 2): exercises interior halos and both image borders.
    out = bottleneck3x3_forward(x, params, pad=1, dilation=1, tile_h=8)
    out = jax.block_until_ready(out)
    assert out.shape == (N, inplanes, H, W)
    # Tolerance loosened slightly because the 1x1-conv matmuls use bf16 MXU inputs.
    np.testing.assert_allclose(np.asarray(out), np.asarray(ref), rtol=2e-2, atol=2e-2)

    # Auto tile_h (generation-aware VMEM budget) -> typically one tile per image.
    out2 = bottleneck3x3_forward(x, params, pad=1, dilation=1)
    out2 = jax.block_until_ready(out2)
    np.testing.assert_allclose(np.asarray(out2), np.asarray(ref), rtol=2e-2, atol=2e-2)

    print("KERNEL_OK")
</pallas_src>

<mosaic_0001>
module attributes {stable_mosaic.version = 11 : i64} {
  func.func @_bottleneck_kernel(%arg0: i32, %arg1: i32, %arg2: memref<1x8x16x4xf32, #tpu.memory_space<vmem>>, %arg3: memref<1x1x16x4xf32, #tpu.memory_space<vmem>>, %arg4: memref<1x1x16x4xf32, #tpu.memory_space<vmem>>, %arg5: memref<4x128xbf16, #tpu.memory_space<vmem>>, %arg6: memref<2x128xf32, #tpu.memory_space<vmem>>, %arg7: memref<9x128xf32, #tpu.memory_space<vmem>>, %arg8: memref<2x128xf32, #tpu.memory_space<vmem>>, %arg9: memref<128x4xbf16, #tpu.memory_space<vmem>>, %arg10: memref<2x4xf32, #tpu.memory_space<vmem>>, %arg11: memref<1x8x16x4xf32, #tpu.memory_space<vmem>>, %arg12: memref<10x24x128xf32, #tpu.memory_space<vmem>>) attributes {dimension_semantics = [#tpu.dimension_semantics<parallel>, #tpu.dimension_semantics<parallel>], iteration_bounds = array<i64: 2, 2>, scalar_prefetch = 0 : i64, scratch_operands = 1 : i64, tpu.core_type = #tpu.core_type<tc>, window_params = [{transform_indices = @transform_0, window_bounds = array<i64: 1, 8, 16, 4>}, {transform_indices = @transform_1, window_bounds = array<i64: 1, 1, 16, 4>}, {transform_indices = @transform_2, window_bounds = array<i64: 1, 1, 16, 4>}, {pipeline_mode = #tpu.pipeline_mode<synchronous>, transform_indices = @transform_3, window_bounds = array<i64: 4, 128>}, {pipeline_mode = #tpu.pipeline_mode<synchronous>, transform_indices = @transform_4, window_bounds = array<i64: 2, 128>}, {pipeline_mode = #tpu.pipeline_mode<synchronous>, transform_indices = @transform_5, window_bounds = array<i64: 9, 128>}, {pipeline_mode = #tpu.pipeline_mode<synchronous>, transform_indices = @transform_6, window_bounds = array<i64: 2, 128>}, {pipeline_mode = #tpu.pipeline_mode<synchronous>, transform_indices = @transform_7, window_bounds = array<i64: 128, 4>}, {pipeline_mode = #tpu.pipeline_mode<synchronous>, transform_indices = @transform_8, window_bounds = array<i64: 2, 4>}, {transform_indices = @transform_9, window_bounds = array<i64: 1, 8, 16, 4>}]} {
    %c0_i32 = arith.constant 0 : i32
    %0 = arith.cmpi eq, %arg1, %c0_i32 : i32
    %c1_i32 = arith.constant 1 : i32
    %1 = arith.cmpi eq, %arg1, %c1_i32 : i32
    %c0 = arith.constant 0 : index
    %c0_0 = arith.constant 0 : index
    %2 = vector.load %arg5[%c0, %c0_0] : memref<4x128xbf16, #tpu.memory_space<vmem>>, vector<4x128xbf16>
    %c0_1 = arith.constant 0 : index
    %c0_2 = arith.constant 0 : index
    %3 = vector.load %arg6[%c0_1, %c0_2] : memref<2x128xf32, #tpu.memory_space<vmem>>, vector<1x128xf32>
    %4 = vector.shape_cast %3 : vector<1x128xf32> to vector<128xf32>
    %c1 = arith.constant 1 : index
    %c0_3 = arith.constant 0 : index
    %5 = vector.load %arg6[%c1, %c0_3] : memref<2x128xf32, #tpu.memory_space<vmem>>, vector<1x128xf32>
    %6 = vector.shape_cast %5 : vector<1x128xf32> to vector<128xf32>
    %c0_4 = arith.constant 0 : index
    %c0_5 = arith.constant 0 : index
    %c0_6 = arith.constant 0 : index
    %c0_7 = arith.constant 0 : index
    %7 = vector.load %arg2[%c0_4, %c0_5, %c0_6, %c0_7] : memref<1x8x16x4xf32, #tpu.memory_space<vmem>>, vector<1x8x16x4xf32>
    %8 = vector.shape_cast %7 : vector<1x8x16x4xf32> to vector<8x16x4xf32>
    %9 = vector.shape_cast %8 : vector<8x16x4xf32> to vector<128x4xf32>
    %10 = arith.truncf %9 : vector<128x4xf32> to vector<128x4xbf16>
    %cst = arith.constant dense<0.000000e+00> : vector<128x128xf32>
    %11 = tpu.matmul %10, %2, %cst {dimension_numbers = #tpu.dot_dimension_numbers<[1], [0], [0], [1], [0, 0, 1, 1], [], []>} : vector<128x4xbf16>, vector<4x128xbf16>, vector<128x128xf32> -> vector<128x128xf32>
    %12 = vector.shape_cast %4 : vector<128xf32> to vector<1x128xf32>
    %13 = vector.broadcast %12 : vector<1x128xf32> to vector<128x128xf32>
    %14 = arith.addf %11, %13 : vector<128x128xf32>
    %cst_8 = arith.constant 0.000000e+00 : f32
    %15 = vector.broadcast %cst_8 : f32 to vector<128x128xf32>
    %16 = arith.cmpf oge, %14, %15 : vector<128x128xf32>
    %17 = vector.shape_cast %6 : vector<128xf32> to vector<1x128xf32>
    %18 = vector.broadcast %17 : vector<1x128xf32> to vector<128x128xf32>
    %19 = arith.mulf %18, %14 : vector<128x128xf32>
    %20 = arith.select %16, %14, %19 : vector<128x128xi1>, vector<128x128xf32>
    %21 = vector.shape_cast %20 : vector<128x128xf32> to vector<8x16x128xf32>
    %c1_9 = arith.constant 1 : index
    %c0_10 = arith.constant 0 : index
    %c0_11 = arith.constant 0 : index
    %22 = vector.load %arg12[%c1_9, %c0_10, %c0_11] : memref<10x24x128xf32, #tpu.memory_space<vmem>>, vector<8x16x128xf32>
    tpu.vector_store %arg12[%c1_9, %c0_10, %c0_11], %21 {strides = array<i32>} : memref<10x24x128xf32, #tpu.memory_space<vmem>>, vector<8x16x128xf32>,
    %c0_12 = arith.constant 0 : index
    %c0_13 = arith.constant 0 : index
    %c0_14 = arith.constant 0 : index
    %c0_15 = arith.constant 0 : index
    %23 = vector.load %arg3[%c0_12, %c0_13, %c0_14, %c0_15] : memref<1x1x16x4xf32, #tpu.memory_space<vmem>>, vector<1x1x16x4xf32>
    %24 = vector.shape_cast %23 : vector<1x1x16x4xf32> to vector<1x16x4xf32>
    %25 = vector.shape_cast %24 : vector<1x16x4xf32> to vector<16x4xf32>
    %26 = arith.truncf %25 : vector<16x4xf32> to vector<16x4xbf16>
    %cst_16 = arith.constant dense<0.000000e+00> : vector<16x128xf32>
    %27 = tpu.matmul %26, %2, %cst_16 {dimension_numbers = #tpu.dot_dimension_numbers<[1], [0], [0], [1], [0, 0, 1, 1], [], []>} : vector<16x4xbf16>, vector<4x128xbf16>, vector<16x128xf32> -> vector<16x128xf32>
    %28 = vector.shape_cast %4 : vector<128xf32> to vector<1x128xf32>
    %29 = vector.broadcast %28 : vector<1x128xf32> to vector<16x128xf32>
    %30 = arith.addf %27, %29 : vector<16x128xf32>
    %cst_17 = arith.constant 0.000000e+00 : f32
    %31 = vector.broadcast %cst_17 : f32 to vector<16x128xf32>
    %32 = arith.cmpf oge, %30, %31 : vector<16x128xf32>
    %33 = vector.shape_cast %6 : vector<128xf32> to vector<1x128xf32>
    %34 = vector.broadcast %33 : vector<1x128xf32> to vector<16x128xf32>
    %35 = arith.mulf %34, %30 : vector<16x128xf32>
    %36 = arith.select %32, %30, %35 : vector<16x128xi1>, vector<16x128xf32>
    %37 = vector.shape_cast %36 : vector<16x128xf32> to vector<1x16x128xf32>
    %cst_18 = arith.constant 0.000000e+00 : f32
    %38 = vector.broadcast %cst_18 : f32 to vector<1x16x128xf32>
    %39 = arith.select %0, %38, %37 : vector<1x16x128xf32>
    %c0_19 = arith.constant 0 : index
    %c0_20 = arith.constant 0 : index
    %c0_21 = arith.constant 0 : index
    %40 = vector.load %arg12[%c0_19, %c0_20, %c0_21] : memref<10x24x128xf32, #tpu.memory_space<vmem>>, vector<1x16x128xf32>
    tpu.vector_store %arg12[%c0_19, %c0_20, %c0_21], %39 {strides = array<i32>} : memref<10x24x128xf32, #tpu.memory_space<vmem>>, vector<1x16x128xf32>,
    %c0_22 = arith.constant 0 : index
    %c0_23 = arith.constant 0 : index
    %c0_24 = arith.constant 0 : index
    %c0_25 = arith.constant 0 : index
    %41 = vector.load %arg4[%c0_22, %c0_23, %c0_24, %c0_25] : memref<1x1x16x4xf32, #tpu.memory_space<vmem>>, vector<1x1x16x4xf32>
    %42 = vector.shape_cast %41 : vector<1x1x16x4xf32> to vector<1x16x4xf32>
    %43 = vector.shape_cast %42 : vector<1x16x4xf32> to vector<16x4xf32>
    %44 = arith.truncf %43 : vector<16x4xf32> to vector<16x4xbf16>
    %cst_26 = arith.constant dense<0.000000e+00> : vector<16x128xf32>
    %45 = tpu.matmul %44, %2, %cst_26 {dimension_numbers = #tpu.dot_dimension_numbers<[1], [0], [0], [1], [0, 0, 1, 1], [], []>} : vector<16x4xbf16>, vector<4x128xbf16>, vector<16x128xf32> -> vector<16x128xf32>
    %46 = vector.shape_cast %4 : vector<128xf32> to vector<1x128xf32>
    %47 = vector.broadcast %46 : vector<1x128xf32> to vector<16x128xf32>
    %48 = arith.addf %45, %47 : vector<16x128xf32>
    %cst_27 = arith.constant 0.000000e+00 : f32
    %49 = vector.broadcast %cst_27 : f32 to vector<16x128xf32>
    %50 = arith.cmpf oge, %48, %49 : vector<16x128xf32>
    %51 = vector.shape_cast %6 : vector<128xf32> to vector<1x128xf32>
    %52 = vector.broadcast %51 : vector<1x128xf32> to vector<16x128xf32>
    %53 = arith.mulf %52, %48 : vector<16x128xf32>
    %54 = arith.select %50, %48, %53 : vector<16x128xi1>, vector<16x128xf32>
    %55 = vector.shape_cast %54 : vector<16x128xf32> to vector<1x16x128xf32>
    %cst_28 = arith.constant 0.000000e+00 : f32
    %56 = vector.broadcast %cst_28 : f32 to vector<1x16x128xf32>
    %57 = arith.select %1, %56, %55 : vector<1x16x128xf32>
    %c9 = arith.constant 9 : index
    %c0_29 = arith.constant 0 : index
    %c0_30 = arith.constant 0 : index
    %58 = vector.load %arg12[%c9, %c0_29, %c0_30] : memref<10x24x128xf32, #tpu.memory_space<vmem>>, vector<1x16x128xf32>
    tpu.vector_store %arg12[%c9, %c0_29, %c0_30], %57 {strides = array<i32>} : memref<10x24x128xf32, #tpu.memory_space<vmem>>, vector<1x16x128xf32>,
    %cst_31 = arith.constant 0.000000e+00 : f32
    %59 = vector.broadcast %cst_31 : f32 to vector<10x8x128xf32>
    %c0_32 = arith.constant 0 : index
    %c16 = arith.constant 16 : index
    %c0_33 = arith.constant 0 : index
    %60 = vector.load %arg12[%c0_32, %c16, %c0_33] : memref<10x24x128xf32, #tpu.memory_space<vmem>>, vector<10x8x128xf32>
    tpu.vector_store %arg12[%c0_32, %c16, %c0_33], %59 {strides = array<i32>} : memref<10x24x128xf32, #tpu.memory_space<vmem>>, vector<10x8x128xf32>,
    %c0_34 = arith.constant 0 : index
    %c0_35 = arith.constant 0 : index
    %61 = vector.load %arg7[%c0_34, %c0_35] : memref<9x128xf32, #tpu.memory_space<vmem>>, vector<9x128xf32>
    %cst_36 = arith.constant 0.000000e+00 : f32
    %62 = vector.broadcast %cst_36 : f32 to vector<8x24x128xf32>
    %c0_37 = arith.constant 0 : index
    %c0_38 = arith.constant 0 : index
    %c0_39 = arith.constant 0 : index
    %63 = vector.load %arg12[%c0_37, %c0_38, %c0_39] : memref<10x24x128xf32, #tpu.memory_space<vmem>>, vector<8x24x128xf32>
    %c1_i32_40 = arith.constant 1 : i32
    %64 = tpu.dynamic_rotate %63 by %c1_i32_40 dim 1 : vector<8x24x128xf32>, i32 -> vector<8x24x128xf32>
    %65 = vector.extract_strided_slice %61 {offsets = [0, 0], sizes = [1, 128], strides = [1, 1]} : vector<9x128xf32> to vector<1x128xf32>
    %66 = vector.shape_cast %65 : vector<1x128xf32> to vector<128xf32>
    %67 = vector.shape_cast %66 : vector<128xf32> to vector<1x1x128xf32>
    %68 = vector.broadcast %67 : vector<1x1x128xf32> to vector<8x24x128xf32>
    %69 = arith.mulf %64, %68 : vector<8x24x128xf32>
    %70 = arith.addf %62, %69 : vector<8x24x128xf32>
    %71 = vector.extract_strided_slice %61 {offsets = [1, 0], sizes = [1, 128], strides = [1, 1]} : vector<9x128xf32> to vector<1x128xf32>
    %72 = vector.shape_cast %71 : vector<1x128xf32> to vector<128xf32>
    %73 = vector.shape_cast %72 : vector<128xf32> to vector<1x1x128xf32>
    %74 = vector.broadcast %73 : vector<1x1x128xf32> to vector<8x24x128xf32>
    %75 = arith.mulf %63, %74 : vector<8x24x128xf32>
    %76 = arith.addf %70, %75 : vector<8x24x128xf32>
    %c23_i32 = arith.constant 23 : i32
    %77 = tpu.dynamic_rotate %63 by %c23_i32 dim 1 : vector<8x24x128xf32>, i32 -> vector<8x24x128xf32>
    %78 = vector.extract_strided_slice %61 {offsets = [2, 0], sizes = [1, 128], strides = [1, 1]} : vector<9x128xf32> to vector<1x128xf32>
    %79 = vector.shape_cast %78 : vector<1x128xf32> to vector<128xf32>
    %80 = vector.shape_cast %79 : vector<128xf32> to vector<1x1x128xf32>
    %81 = vector.broadcast %80 : vector<1x1x128xf32> to vector<8x24x128xf32>
    %82 = arith.mulf %77, %81 : vector<8x24x128xf32>
    %83 = arith.addf %76, %82 : vector<8x24x128xf32>
    %c1_41 = arith.constant 1 : index
    %c0_42 = arith.constant 0 : index
    %c0_43 = arith.constant 0 : index
    %84 = vector.load %arg12[%c1_41, %c0_42, %c0_43] : memref<10x24x128xf32, #tpu.memory_space<vmem>>, vector<8x24x128xf32>
    %c1_i32_44 = arith.constant 1 : i32
    %85 = tpu.dynamic_rotate %84 by %c1_i32_44 dim 1 : vector<8x24x128xf32>, i32 -> vector<8x24x128xf32>
    %86 = vector.extract_strided_slice %61 {offsets = [3, 0], sizes = [1, 128], strides = [1, 1]} : vector<9x128xf32> to vector<1x128xf32>
    %87 = vector.shape_cast %86 : vector<1x128xf32> to vector<128xf32>
    %88 = vector.shape_cast %87 : vector<128xf32> to vector<1x1x128xf32>
    %89 = vector.broadcast %88 : vector<1x1x128xf32> to vector<8x24x128xf32>
    %90 = arith.mulf %85, %89 : vector<8x24x128xf32>
    %91 = arith.addf %83, %90 : vector<8x24x128xf32>
    %92 = vector.extract_strided_slice %61 {offsets = [4, 0], sizes = [1, 128], strides = [1, 1]} : vector<9x128xf32> to vector<1x128xf32>
    %93 = vector.shape_cast %92 : vector<1x128xf32> to vector<128xf32>
    %94 = vector.shape_cast %93 : vector<128xf32> to vector<1x1x128xf32>
    %95 = vector.broadcast %94 : vector<1x1x128xf32> to vector<8x24x128xf32>
    %96 = arith.mulf %84, %95 : vector<8x24x128xf32>
    %97 = arith.addf %91, %96 : vector<8x24x128xf32>
    %c23_i32_45 = arith.constant 23 : i32
    %98 = tpu.dynamic_rotate %84 by %c23_i32_45 dim 1 : vector<8x24x128xf32>, i32 -> vector<8x24x128xf32>
    %99 = vector.extract_strided_slice %61 {offsets = [5, 0], sizes = [1, 128], strides = [1, 1]} : vector<9x128xf32> to vector<1x128xf32>
    %100 = vector.shape_cast %99 : vector<1x128xf32> to vector<128xf32>
    %101 = vector.shape_cast %100 : vector<128xf32> to vector<1x1x128xf32>
    %102 = vector.broadcast %101 : vector<1x1x128xf32> to vector<8x24x128xf32>
    %103 = arith.mulf %98, %102 : vector<8x24x128xf32>
    %104 = arith.addf %97, %103 : vector<8x24x128xf32>
    %c2 = arith.constant 2 : index
    %c0_46 = arith.constant 0 : index
    %c0_47 = arith.constant 0 : index
    %105 = vector.load %arg12[%c2, %c0_46, %c0_47] : memref<10x24x128xf32, #tpu.memory_space<vmem>>, vector<8x24x128xf32>
    %c1_i32_48 = arith.constant 1 : i32
    %106 = tpu.dynamic_rotate %105 by %c1_i32_48 dim 1 : vector<8x24x128xf32>, i32 -> vector<8x24x128xf32>
    %107 = vector.extract_strided_slice %61 {offsets = [6, 0], sizes = [1, 128], strides = [1, 1]} : vector<9x128xf32> to vector<1x128xf32>
    %108 = vector.shape_cast %107 : vector<1x128xf32> to vector<128xf32>
    %109 = vector.shape_cast %108 : vector<128xf32> to vector<1x1x128xf32>
    %110 = vector.broadcast %109 : vector<1x1x128xf32> to vector<8x24x128xf32>
    %111 = arith.mulf %106, %110 : vector<8x24x128xf32>
    %112 = arith.addf %104, %111 : vector<8x24x128xf32>
    %113 = vector.extract_strided_slice %61 {offsets = [7, 0], sizes = [1, 128], strides = [1, 1]} : vector<9x128xf32> to vector<1x128xf32>
    %114 = vector.shape_cast %113 : vector<1x128xf32> to vector<128xf32>
    %115 = vector.shape_cast %114 : vector<128xf32> to vector<1x1x128xf32>
    %116 = vector.broadcast %115 : vector<1x1x128xf32> to vector<8x24x128xf32>
    %117 = arith.mulf %105, %116 : vector<8x24x128xf32>
    %118 = arith.addf %112, %117 : vector<8x24x128xf32>
    %c23_i32_49 = arith.constant 23 : i32
    %119 = tpu.dynamic_rotate %105 by %c23_i32_49 dim 1 : vector<8x24x128xf32>, i32 -> vector<8x24x128xf32>
    %120 = vector.extract_strided_slice %61 {offsets = [8, 0], sizes = [1, 128], strides = [1, 1]} : vector<9x128xf32> to vector<1x128xf32>
    %121 = vector.shape_cast %120 : vector<1x128xf32> to vector<128xf32>
    %122 = vector.shape_cast %121 : vector<128xf32> to vector<1x1x128xf32>
    %123 = vector.broadcast %122 : vector<1x1x128xf32> to vector<8x24x128xf32>
    %124 = arith.mulf %119, %123 : vector<8x24x128xf32>
    %125 = arith.addf %118, %124 : vector<8x24x128xf32>
    %126 = vector.extract_strided_slice %125 {offsets = [0, 0, 0], sizes = [8, 16, 128], strides = [1, 1, 1]} : vector<8x24x128xf32> to vector<8x16x128xf32>
    %c0_50 = arith.constant 0 : index
    %c0_51 = arith.constant 0 : index
    %127 = vector.load %arg8[%c0_50, %c0_51] : memref<2x128xf32, #tpu.memory_space<vmem>>, vector<1x128xf32>
    %128 = vector.shape_cast %127 : vector<1x128xf32> to vector<128xf32>
    %129 = vector.shape_cast %128 : vector<128xf32> to vector<1x1x128xf32>
    %130 = vector.broadcast %129 : vector<1x1x128xf32> to vector<8x16x128xf32>
    %131 = arith.addf %126, %130 : vector<8x16x128xf32>
    %cst_52 = arith.constant 0.000000e+00 : f32
    %132 = vector.broadcast %cst_52 : f32 to vector<8x16x128xf32>
    %133 = arith.cmpf oge, %131, %132 : vector<8x16x128xf32>
    %c1_53 = arith.constant 1 : index
    %c0_54 = arith.constant 0 : index
    %134 = vector.load %arg8[%c1_53, %c0_54] : memref<2x128xf32, #tpu.memory_space<vmem>>, vector<1x128xf32>
    %135 = vector.shape_cast %134 : vector<1x128xf32> to vector<128xf32>
    %136 = vector.shape_cast %135 : vector<128xf32> to vector<1x1x128xf32>
    %137 = vector.broadcast %136 : vector<1x1x128xf32> to vector<8x16x128xf32>
    %138 = arith.mulf %137, %131 : vector<8x16x128xf32>
    %139 = arith.select %133, %131, %138 : vector<8x16x128xi1>, vector<8x16x128xf32>
    %140 = vector.shape_cast %139 : vector<8x16x128xf32> to vector<128x128xf32>
    %141 = arith.truncf %140 : vector<128x128xf32> to vector<128x128xbf16>
    %c0_55 = arith.constant 0 : index
    %c0_56 = arith.constant 0 : index
    %142 = vector.load %arg9[%c0_55, %c0_56] : memref<128x4xbf16, #tpu.memory_space<vmem>>, vector<128x4xbf16>
    %cst_57 = arith.constant dense<0.000000e+00> : vector<128x4xf32>
    %143 = tpu.matmul %141, %142, %cst_57 {dimension_numbers = #tpu.dot_dimension_numbers<[1], [0], [0], [1], [0, 0, 1, 1], [], []>} : vector<128x128xbf16>, vector<128x4xbf16>, vector<128x4xf32> -> vector<128x4xf32>
    %c0_58 = arith.constant 0 : index
    %c0_59 = arith.constant 0 : index
    %144 = vector.load %arg10[%c0_58, %c0_59] : memref<2x4xf32, #tpu.memory_space<vmem>>, vector<1x4xf32>
    %145 = vector.shape_cast %144 : vector<1x4xf32> to vector<4xf32>
    %146 = vector.shape_cast %145 : vector<4xf32> to vector<1x4xf32>
    %147 = vector.broadcast %146 : vector<1x4xf32> to vector<128x4xf32>
    %148 = arith.addf %143, %147 : vector<128x4xf32>
    %149 = vector.shape_cast %148 : vector<128x4xf32> to vector<8x16x4xf32>
    %c0_60 = arith.constant 0 : index
    %c0_61 = arith.constant 0 : index
    %c0_62 = arith.constant 0 : index
    %c0_63 = arith.constant 0 : index
    %150 = vector.load %arg2[%c0_60, %c0_61, %c0_62, %c0_63] : memref<1x8x16x4xf32, #tpu.memory_space<vmem>>, vector<1x8x16x4xf32>
    %151 = vector.shape_cast %150 : vector<1x8x16x4xf32> to vector<8x16x4xf32>
    %152 = arith.addf %149, %151 : vector<8x16x4xf32>
    %cst_64 = arith.constant 0.000000e+00 : f32
    %153 = vector.broadcast %cst_64 : f32 to vector<8x16x4xf32>
    %154 = arith.cmpf oge, %152, %153 : vector<8x16x4xf32>
    %c1_65 = arith.constant 1 : index
    %c0_66 = arith.constant 0 : index
    %155 = vector.load %arg10[%c1_65, %c0_66] : memref<2x4xf32, #tpu.memory_space<vmem>>, vector<1x4xf32>
    %156 = vector.shape_cast %155 : vector<1x4xf32> to vector<4xf32>
    %157 = vector.shape_cast %156 : vector<4xf32> to vector<1x1x4xf32>
    %158 = vector.broadcast %157 : vector<1x1x4xf32> to vector<8x16x4xf32>
    %159 = arith.mulf %158, %152 : vector<8x16x4xf32>
    %160 = arith.select %154, %152, %159 : vector<8x16x4xi1>, vector<8x16x4xf32>
    %c0_67 = arith.constant 0 : index
    %c0_68 = arith.constant 0 : index
    %c0_69 = arith.constant 0 : index
    %c0_70 = arith.constant 0 : index
    %161 = vector.load %arg11[%c0_67, %c0_68, %c0_69, %c0_70] : memref<1x8x16x4xf32, #tpu.memory_space<vmem>>, vector<1x8x16x4xf32>
    %162 = vector.shape_cast %161 : vector<1x8x16x4xf32> to vector<8x16x4xf32>
    %163 = vector.shape_cast %160 : vector<8x16x4xf32> to vector<1x8x16x4xf32>
    tpu.vector_store %arg11[%c0_67, %c0_68, %c0_69, %c0_70], %163 {strides = array<i32>} : memref<1x8x16x4xf32, #tpu.memory_space<vmem>>, vector<1x8x16x4xf32>,
    return
  }
  func.func @transform_0(%arg0: i32, %arg1: i32) -> (i32, i32, i32, i32) {
    %c0_i32 = arith.constant 0 : i32
    %c0_i32_0 = arith.constant 0 : i32
    %c0_i32_1 = arith.constant 0 : i32
    return %arg0, %arg1, %c0_i32, %c0_i32_0 : i32, i32, i32, i32
  }
  func.func @transform_1(%arg0: i32, %arg1: i32) -> (i32, i32, i32, i32) {
    %c8_i32 = arith.constant 8 : i32
    %0 = arith.muli %arg1, %c8_i32 : i32
    %c1_i32 = arith.constant 1 : i32
    %1 = arith.subi %0, %c1_i32 : i32
    %c0_i32 = arith.constant 0 : i32
    %2 = arith.maxsi %1, %c0_i32 : i32
    %c0_i32_0 = arith.constant 0 : i32
    %c0_i32_1 = arith.constant 0 : i32
    %c0_i32_2 = arith.constant 0 : i32
    return %arg0, %2, %c0_i32_0, %c0_i32_1 : i32, i32, i32, i32
  }
  func.func @transform_2(%arg0: i32, %arg1: i32) -> (i32, i32, i32, i32) {
    %c1_i32 = arith.constant 1 : i32
    %0 = arith.addi %arg1, %c1_i32 : i32
    %c8_i32 = arith.constant 8 : i32
    %1 = arith.muli %0, %c8_i32 : i32
    %c15_i32 = arith.constant 15 : i32
    %2 = arith.minsi %1, %c15_i32 : i32
    %c0_i32 = arith.constant 0 : i32
    %c0_i32_0 = arith.constant 0 : i32
    %c0_i32_1 = arith.constant 0 : i32
    return %arg0, %2, %c0_i32, %c0_i32_0 : i32, i32, i32, i32
  }
  func.func @transform_3(%arg0: i32, %arg1: i32) -> (i32, i32) {
    %c0_i32 = arith.constant 0 : i32
    %c0_i32_0 = arith.constant 0 : i32
    %c0_i32_1 = arith.constant 0 : i32
    return %c0_i32, %c0_i32_0 : i32, i32
  }
  func.func @transform_4(%arg0: i32, %arg1: i32) -> (i32, i32) {
    %c0_i32 = arith.constant 0 : i32
    %c0_i32_0 = arith.constant 0 : i32
    %c0_i32_1 = arith.constant 0 : i32
    return %c0_i32, %c0_i32_0 : i32, i32
  }
  func.func @transform_5(%arg0: i32, %arg1: i32) -> (i32, i32) {
    %c0_i32 = arith.constant 0 : i32
    %c0_i32_0 = arith.constant 0 : i32
    %c0_i32_1 = arith.constant 0 : i32
    return %c0_i32, %c0_i32_0 : i32, i32
  }
  func.func @transform_6(%arg0: i32, %arg1: i32) -> (i32, i32) {
    %c0_i32 = arith.constant 0 : i32
    %c0_i32_0 = arith.constant 0 : i32
    %c0_i32_1 = arith.constant 0 : i32
    return %c0_i32, %c0_i32_0 : i32, i32
  }
  func.func @transform_7(%arg0: i32, %arg1: i32) -> (i32, i32) {
    %c0_i32 = arith.constant 0 : i32
    %c0_i32_0 = arith.constant 0 : i32
    %c0_i32_1 = arith.constant 0 : i32
    return %c0_i32, %c0_i32_0 : i32, i32
  }
  func.func @transform_8(%arg0: i32, %arg1: i32) -> (i32, i32) {
    %c0_i32 = arith.constant 0 : i32
    %c0_i32_0 = arith.constant 0 : i32
    %c0_i32_1 = arith.constant 0 : i32
    return %c0_i32, %c0_i32_0 : i32, i32
  }
  func.func @transform_9(%arg0: i32, %arg1: i32) -> (i32, i32, i32, i32) {
    %c0_i32 = arith.constant 0 : i32
    %c0_i32_0 = arith.constant 0 : i32
    %c0_i32_1 = arith.constant 0 : i32
    return %arg0, %arg1, %c0_i32, %c0_i32_0 : i32, i32, i32, i32
  }
}

</mosaic_0001>

<bundles_post_ra>
// kernel: tpu_custom_call.1
= control target key start
LH: loop header
LB: loop body
LE: loop exit
PB: predicated region body
PF: predicated region fallthrough
CT: control target
= control target key end

     0   :  { %s2315_s30 = smov 0   ;;  %s2317_s10 = smov 0   ;;  %s3297_s0 = inlined_call_operand.vmem [shape: f32[2,16,16,4], index: 0, kind: input, shape index: {}]   ;;  %s3298_s1 = inlined_call_operand.vmem [shape: f32[2,16,16,4], index: 1, kind: input, shape index: {}]   ;;  %s3299_s2 = inlined_call_operand.vmem [shape: f32[2,16,16,4], index: 2, kind: input, shape index: {}]   ;;  %s3300_s3 = inlined_call_operand.vmem [shape: bf16[4,128], index: 3, kind: input, shape index: {}]   ;;  %s3301_s4 = inlined_call_operand.vmem [shape: f32[2,128], index: 4, kind: input, shape index: {}]   ;;  %s3302_s5 = inlined_call_operand.vmem [shape: f32[9,128], index: 5, kind: input, shape index: {}]   ;;  %s3303_s6 = inlined_call_operand.vmem [shape: f32[2,128], index: 6, kind: input, shape index: {}]   ;;  %s3304_s7 = inlined_call_operand.vmem [shape: bf16[128,4], index: 7, kind: input, shape index: {}]   ;;  %s3305_s8 = inlined_call_operand.vmem [shape: f32[2,4], index: 8, kind: input, shape index: {}]   ;;  %s3306_s9 = inlined_call_operand.vmem [shape: f32[2,16,16,4], index: 9, kind: output, shape index: {}]  }
   0x1   :  { %s2319_s11 = smov 0   ;;  %s2321_s12 = smov 0  }
   0x2   :  { %s2323_s13 = smov 0  }
   0x3 LB: > { %s28_s14 = sadd.s32 1, %s2253_s11  ;;  %s31_s15 = sadd.s32 1, %s2257_s12  ;;  %s2261_s13 = sphi %s2323_s13, %s19_s13   ;;  %s2257_s12 = sphi %s2321_s12, %s3378_s12   ;;  %s2253_s11 = sphi %s2319_s11, %s3377_s11   ;;  %s2249_s10 = sphi %s2317_s10, %s3376_s10   ;;  %s2245_s30 = sphi %s2315_s30, %s3375_s30  }
   0x4   : > { %p29_p0 = scmp.ge.s32.totalorder %s28_s14, 2  ;;  %p2004_p1 = scmp.ge.s32.totalorder %s2261_s13, 1 }
   0x5   : > { %p373_p2 = scmp.lt.s32.totalorder %s2261_s13, 5 }
   0x6   : > { %s3380_s14 = smov (%p29_p0, %s28_s14), 0  ;;  %s3382_s15 = smov (!%p29_p0, %s31_s15), %s2257_s12 }
   0x7   : > { %p374_p3 = pnand %p2004_p1, %p373_p2  ;;  %p33_p4 = scmp.ge.s32.totalorder %s3382_s15, 2 }
   0x9   : > { %s3384_s15 = smov (%p33_p4, %s3382_s15), 0  ;;  %377 = sbr.rel (%p374_p3) target bundleno = 568 (0x238), region = 56 }
   0xe   : > { %v504_v0 = vld [vmem:[%s3300_s3] sm:$0x3]  ;;  %vm560_vm0 = vcmask 1041408   ;;  %s2351_s18 = sshll.u32 %s2245_s30, 3  ;;  %p446_p5 = scmp.lt.s32.totalorder %s2249_s10, 1  ;;  %v2263_v2 = vmov 0.0   ;;  %v911_v41 = vlaneseq }
   0xf   : > { %v562_v1 = vsel %vm560_vm0, %v504_v0, 0  ;;  %2172 = vmatprep.subr.msk.bf16.mxu0 %vm560_vm0, %v504_v0  ;;  %2112 = vmatprep.subr.bf16.mxu1 %v2263_v2  ;;  %p448_p6 = scmp.lt.s32.totalorder %s2351_s18, 15  ;;  %s2010_s19 = sadd.s32 4294967295, %s2351_s18  ;;  %vm2264_vm1 = vmmov 0   ;;  %vm535_vm2 = vcmask 31744   ;;  %v2215_v33 = vld [vmem:[%s3304_s7 + $0x38] sm:$0xff]  }
  0x10   : > { %2095 = vmatpush3.bf16.msra.mxu0 %v562_v1  ;;  %s3386_s10 = smov (!%p446_p5, %s2249_s10), 1  ;;  %2113 = vmatpush3.bf16.msra.mxu1 %v562_v1  ;;  %p458_p7 = scmp.gt.s32.totalorder %s2010_s19, 0  ;;  %v2216_v34 = vld [vmem:[%s3304_s7 + $0x30] sm:$0xff]   ;;  %v2217_v35 = vld [vmem:[%s3304_s7 + $0x28] sm:$0xff]   ;;  %v2218_v36 = vld [vmem:[%s3304_s7 + $0x20] sm:$0xff]   ;;  %v2443_v42 = vshrl.u32 %v911_v41, 7 }
  0x11   : > { %s449_s20 = scalar_select %p448_p6, %s2351_s18, 15  ;;  %2114 = vmatprep.mubr.msk.bf16.mxu1 %vm2264_vm1, %v2263_v2  ;;  %2118 = vmatprep.subr.bf16.mxu1 %v2263_v2  ;;  %v2219_v37 = vld [vmem:[%s3304_s7 + $0x18] sm:$0xff]   ;;  %v2220_v38 = vld [vmem:[%s3304_s7 + $0x10] sm:$0xff]   ;;  %v2221_v39 = vld [vmem:[%s3304_s7 + $0x8] sm:$0xff]   ;;  %v2461_v50 = vrot.slane %v2263_v2, 7  ;;  %v2464_v51 = vrot.slane %v2263_v2, 1 }
  0x12   : > { %s2360_s21 = sshll.u32 %s3386_s10, 5  ;;  %p2011_p8 = scmp.lt.s32.totalorder %s2010_s19, 15  ;;  %2124 = vmatprep.subr.bf16.mxu0 %v2215_v33  ;;  %v2222_v40 = vld [vmem:[%s3304_s7] sm:$0xff]   ;;  %v968_v44 = vsub.s32 1, %v2443_v42  ;;  %v932_v46 = vsub.s32 0, %v2443_v42  ;;  %v1181_v47 = vsub.s32 4, %v2443_v42 }
  0x13   : > { %s2006_s22 = sshll.u32 %s449_s20, 1  ;;  %s2064_s24 = sadd.s32 8, %s2351_s18  ;;  %v2449_v43 = vld [vmem:[%s3301_s4] ss:$0 sm:$0xff]  ;;  %v1394_v48 = vsub.s32 7, %v2443_v42  ;;  %v1145_v49 = vsub.s32 3, %v2443_v42 }
  0x14   : > { %s2363_s23 = sadd.s32 %s2360_s21, %s2006_s22  ;;  %p2367_p9 = scmp.lt.s32.totalorder %s2064_s24, 15  ;;  %v861_v45 = vld [vmem:[%s3302_s5] sm:$0xff]  ;;  %v1045_v54 = vsub.s32 2, %v2443_v42  ;;  %v1257_v55 = vsub.s32 5, %v2443_v42  ;;  %vm913_vm3 = vcmp.lt.s32.totalorder %v2443_v42, 1  ;;  %v1358_v63 = vsub.s32 6, %v2443_v42 }
  0x15   : > { %s2008_s25 = sshll.u32 %s2363_s23, 3  ;;  %p502_p10 = scmp.eq.s32.totalorder %s2245_s30, 0  ;;  %v2469_v52 = vld [vmem:[%s3301_s4 + $0x1] ss:$0 sm:$0xff]  ;;  %v2475_v57 = vrot.slane %v861_v45, %v968_v44  ;;  %v2477_v59 = vrot.slane %v861_v45, %v932_v46  ;;  %v2479_v60 = vrot.slane %v861_v45, %v1181_v47  ;;  %v2481_v61 = vrot.slane %v861_v45, %v1394_v48 }
  0x16   : > { %s2376_s29 = scalar_lea.vmem %s3297_s0, %s2008_s25  ;;  %s3388_s24 = smov (!%p2367_p9, %s2064_s24), 15  ;;  %vm1026_vm6 = vcmp.lt.s32.totalorder %v2443_v42, 7 }
  0x17   : > { %v507_v3 = vld [vmem:[%s2376_s29] sm:$0xff]  ;;  %v508_v4 = vld [vmem:[%s2376_s29 + $0x8] sm:$0xff]  ;;  %v509_v5 = vld [vmem:[%s2376_s29 + $0x10] sm:$0xff]  ;;  %s459_s10 = scalar_select %p458_p7, %s2010_s19, 0 }
  0x18   : > { %v523_v6 = vpack.c.bf16 %v508_v4, %v507_v3  ;;  %v510_v7 = vld [vmem:[%s2376_s29 + $0x18] sm:$0xff]  ;;  %v511_v8 = vld [vmem:[%s2376_s29 + $0x20] sm:$0xff]  ;;  %v512_v9 = vld [vmem:[%s2376_s29 + $0x28] sm:$0xff]  ;;  %s3392_s24 = smov (!%p2367_p9, %s3388_s24), 15  ;;  %p503_p11 = scmp.eq.s32.totalorder %s2245_s30, 1 }
  0x19   : > { %v524_v10 = vpack.c.bf16 %v510_v7, %v509_v5  ;;  %s3390_s10 = smov (!%p2011_p8, %s459_s10), 15  ;;  %v525_v11 = vpack.c.bf16 %v512_v9, %v511_v8  ;;  %v513_v12 = vld [vmem:[%s2376_s29 + $0x30] sm:$0xff]  ;;  %v514_v13 = vld [vmem:[%s2376_s29 + $0x38] sm:$0xff]  ;;  %s2023_s18 = sshll.u32 %s3392_s24, 1  ;;  %v515_v14 = vld [vmem:[%s2376_s29 + $0x40] sm:$0xff]  ;;  %v2497_v5 = vrot.slane %v861_v45, %v1045_v54 }
  0x1a   : > { %2096 = vmatprep.mubr.msk.bf16.mxu0 %vm535_vm2, %v523_v6  ;;  %s2016_s16 = sshll.u32 %s3390_s10, 1  ;;  %v516_v15 = vld [vmem:[%s2376_s29 + $0x48] sm:$0xff]  ;;  %s483_s19 = sadd.s32 %s2023_s18, %s2360_s21  ;;  %v526_v18 = vpack.c.bf16 %v514_v13, %v513_v12  ;;  %v517_v23 = vld [vmem:[%s2376_s29 + $0x50] sm:$0xff]  ;;  %v518_v24 = vld [vmem:[%s2376_s29 + $0x58] sm:$0xff]  ;;  %v2499_v6 = vrot.slane %v861_v45, %v1257_v55  ;;  %v2504_v13 = vrot.slane %v861_v45, %v1358_v63 }
  0x1b   : > { %2097 = vmatmul.mubr.msk.bf16.vlgmr.msra.gmra.mxu0 %vm535_vm2, %v524_v10  ;;  %s466_s17 = sadd.s32 %s2016_s16, %s2360_s21  ;;  %s2025_s28 = sshll.u32 %s483_s19, 3  ;;  %v527_v20 = vpack.c.bf16 %v516_v15, %v515_v14  ;;  %v519_v25 = vld [vmem:[%s2376_s29 + $0x60] sm:$0xff]  ;;  %v520_v26 = vld [vmem:[%s2376_s29 + $0x68] sm:$0xff]  ;;  %v528_v28 = vpack.c.bf16 %v518_v24, %v517_v23  ;;  %v521_v30 = vld [vmem:[%s2376_s29 + $0x70] sm:$0xff] }
  0x1c   : > { %2100 = vmatprep.mubr.msk.bf16.mxu0 %vm535_vm2, %v525_v11  ;;  %s2018_s20 = sshll.u32 %s466_s17, 3  ;;  %s485_s16 = scalar_lea.vmem %s3299_s2, %s2025_s28  ;;  %v529_v29 = vpack.c.bf16 %v520_v26, %v519_v25  ;;  %v522_v31 = vld [vmem:[%s2376_s29 + $0x78] sm:$0xff]  ;;  %2125 = vmatpush3.bf16.msra.mxu0 %v2215_v33 }
  0x1d   : > { %s468_s26 = scalar_lea.vmem %s3298_s1, %s2018_s20  ;;  %v790_v21 = vld [vmem:[%s485_s16] sm:$0xff]  ;;  %v791_v22 = vld [vmem:[%s485_s16 + $0x8] sm:$0xff]  ;;  %v530_v32 = vpack.c.bf16 %v522_v31, %v521_v30  ;;  %2126 = vmatprep.subr.bf16.mxu0 %v2216_v34 }
  0x1e   : > { %v730_v16 = vld [vmem:[%s468_s26] sm:$0xff]  ;;  %v731_v17 = vld [vmem:[%s468_s26 + $0x8] sm:$0xff]  ;;  %v792_v27 = vpack.c.bf16 %v791_v22, %v790_v21  ;;  %s783_s27 = scalar_select %p502_p10, 1, 0 }
  0x1f   : > { %v732_v19 = vpack.c.bf16 %v731_v17, %v730_v16  ;;  %s2486_s16 = scalar_select %p503_p11, 1, 0 }
  0x20   : > { %2127 = vmatpush3.bf16.msra.mxu0 %v2216_v34  ;;  %v784_v58 = vstv %s783_s27 }
  0x21   : > { %2115 = vmatmul.mubr.msk.bf16.vlgmr.msra.gmra.mxu1 %vm535_vm2, %v732_v19  ;;  %2128 = vmatprep.subr.bf16.mxu0 %v2217_v35  ;;  %vm2492_vm5 = vcmp.eq.s32.totalorder %v784_v58, 1 }
  0x22   : > { %2119 = vmatpush3.bf16.msra.mxu1 %v562_v1  ;;  %2120 = vmatprep.mubr.msk.bf16.mxu1 %vm2264_vm1, %v2263_v2  ;;  %v2489_v1 = vrot.slane %v861_v45, %v1145_v49 }
  0x23   : > { %2101 = vmatmul.mubr.msk.bf16.gmra.mxu0 %vm535_vm2, %v526_v18  ;;  %2156 = vmatprep.subr.bf16.mxu1 %v2215_v33 }
  0x24   : > { %2104 = vmatprep.mubr.msk.bf16.mxu0 %vm535_vm2, %v527_v20  ;;  %2129 = vmatpush3.bf16.msra.mxu0 %v2217_v35 }
  0x25   : > { %2130 = vmatprep.subr.bf16.mxu0 %v2218_v36 }
  0x28   : > { %2131 = vmatpush3.bf16.msra.mxu0 %v2218_v36 }
  0x29   : > { %2121 = vmatmul.mubr.msk.bf16.vlgmr.msra.gmra.mxu1 %vm535_vm2, %v792_v27  ;;  %2132 = vmatprep.subr.bf16.mxu0 %v2219_v37 }
  0x2a   : > { %2164 = vmatpush3.bf16.msra.mxu1 %v2215_v33 }
  0x2b   : > { %2105 = vmatmul.mubr.msk.bf16.gmra.mxu0 %vm535_vm2, %v528_v28  ;;  %2157 = vmatprep.subr.bf16.mxu1 %v2216_v34 }
  0x2c   : > { %2108 = vmatprep.mubr.msk.bf16.mxu0 %vm535_vm2, %v529_v29  ;;  %2133 = vmatpush3.bf16.msra.mxu0 %v2219_v37 }
  0x2d   : > { %2134 = vmatprep.subr.bf16.mxu0 %v2220_v38 }
  0x2e   : > { %2165 = vmatpush3.bf16.msra.mxu1 %v2216_v34 }
  0x2f   : > { %2158 = vmatprep.subr.bf16.mxu1 %v2217_v35 }
  0x30   : > { %2135 = vmatpush3.bf16.msra.mxu0 %v2220_v38 }
  0x31   : > { %2136 = vmatprep.subr.bf16.mxu0 %v2221_v39 }
  0x32   : > { %2166 = vmatpush3.bf16.msra.mxu1 %v2217_v35 }
  0x33   : > { %2109 = vmatmul.mubr.msk.bf16.gmra.mxu0 %vm535_vm2, %v530_v32  ;;  %2159 = vmatprep.subr.bf16.mxu1 %v2218_v36 }
  0x34   : > { %2137 = vmatpush3.bf16.msra.mxu0 %v2221_v39 }
  0x35   : > { %2138 = vmatprep.subr.bf16.mxu0 %v2222_v40 }
  0x36   : > { %2167 = vmatpush3.bf16.msra.mxu1 %v2218_v36 }
  0x37   : > { %2160 = vmatprep.subr.bf16.mxu1 %v2219_v37 }
  0x38   : > { %2139 = vmatpush3.bf16.msra.mxu0 %v2222_v40 }
  0x3a   : > { %2168 = vmatpush3.bf16.msra.mxu1 %v2219_v37 }
  0x3b   : > { %2161 = vmatprep.subr.bf16.mxu1 %v2220_v38 }
  0x3e   : > { %2169 = vmatpush3.bf16.msra.mxu1 %v2220_v38 }
  0x3f   : > { %2162 = vmatprep.subr.bf16.mxu1 %v2221_v39 }
  0x42   : > { %2170 = vmatpush3.bf16.msra.mxu1 %v2221_v39 }
  0x43   : > { %2163 = vmatprep.subr.bf16.mxu1 %v2222_v40 }
  0x46   : > { %2171 = vmatpush3.bf16.msra.mxu1 %v2222_v40 }
  0xdb   : > { %v2098_v53 = vpop.f32.mrf.mxu0 }
  0xdc   : > { %v607_v56 = vadd.f32 %v2098_v53, %v2449_v43 }
  0xdd   : > { %v598_v62 = vpop.f32.mrf.mxu0 }
  0xde   : > { %vm663_vm4 = vcmp.ge.f32.partialorder %v607_v56, 0.0  ;;  %v683_v0 = vmul.f32 %v2469_v52, %v607_v56  ;;  %v599_v2 = vadd.f32 %v2449_v43, %v598_v62 }
  0xdf   : > { %v2099_v4 = vpop.f32.mrf.mxu0 }
  0xe0   : > { %v699_v7 = vsel %vm663_vm4, %v607_v56, %v683_v0  ;;  %vm661_vm7 = vcmp.ge.f32.partialorder %v599_v2, 0.0  ;;  %v681_v8 = vmul.f32 %v2469_v52, %v599_v2  ;;  %v610_v9 = vadd.f32 %v2099_v4, %v2449_v43 }
  0xe1   : > { %v889_v10 = vrot.slane %v699_v7, 7  ;;  %v974_v11 = vmul.f32 %v2475_v57, %v699_v7  ;;  %v601_v12 = vpop.f32.mrf.mxu0  ;;  %v1004_v15 = vrot.slane %v699_v7, 1  ;;  %v770_v17 = vpop.f32.mrf.mxu1  ;;  %v2516_v20 = vmul.f32 %v2479_v60, %v699_v7 }
  0xe2   : > { %v2507_v16 = vsel %vm661_vm7, %v599_v2, %v681_v8  ;;  %vm664_vm8 = vcmp.ge.f32.partialorder %v610_v9, 0.0  ;;  %v684_v18 = vmul.f32 %v2469_v52, %v610_v9  ;;  %v2519_v21 = vmul.f32 %v2481_v61, %v699_v7 }
  0xe3   : > { %v2513_v19 = vsel %vm913_vm3, %v2461_v50, %v889_v10  ;;  %v888_v22 = vrot.slane %v2507_v16, 7  ;;  %v2102_v23 = vpop.f32.mrf.mxu0  ;;  %v972_v25 = vmul.f32 %v2475_v57, %v2507_v16  ;;  %v1003_v26 = vrot.slane %v2507_v16, 1  ;;  %v2116_v28 = vpop.f32.mrf.mxu1 }
  0xe4   : > { %3322 = vst [vmem:[#allocation3_spill] sm:$0xff] %v2519_v21  ;;  %v938_v24 = vmul.f32 %v2477_v59, %v2513_v19  ;;  %v771_v27 = vadd.f32 %v2449_v43, %v770_v17  ;;  %v2530_v29 = vmul.f32 %v2489_v1, %v2513_v19  ;;  %v2539_v31 = vmul.f32 %v2479_v60, %v2507_v16 }
  0xe5   : > { %v923_v30 = vsel %vm913_vm3, %v2461_v50, %v888_v22  ;;  %v700_v32 = vsel %vm664_vm8, %v610_v9, %v684_v18  ;;  %v602_v34 = vadd.f32 %v2449_v43, %v601_v12  ;;  %v773_v35 = vpop.f32.mrf.mxu1  ;;  %v623_v36 = vadd.f32 %v2102_v23, %v2449_v43 }
  0xe6   : > { %v936_v33 = vmul.f32 %v2477_v59, %v923_v30  ;;  %vm777_vm9 = vcmp.ge.f32.partialorder %v771_v27, 0.0  ;;  %v2544_v37 = vadd.f32 %v974_v11, %v938_v24  ;;  %v779_v38 = vmul.f32 %v2469_v52, %v771_v27  ;;  %v614_v11 = vpop.f32.mrf.mxu0 }
  0xe7   : > { %v897_v39 = vrot.slane %v700_v32, 7  ;;  %v1012_v40 = vrot.slane %v700_v32, 1  ;;  %v2548_v44 = vmul.f32 %v2489_v1, %v923_v30  ;;  %v975_v45 = vmul.f32 %v2475_v57, %v700_v32  ;;  %v2117_v47 = vpop.f32.mrf.mxu1 }
  0xe8   : > { %v988_v41 = vadd.f32 %v972_v25, %v936_v33  ;;  %v2552_v46 = vmul.f32 %v2479_v60, %v700_v32  ;;  %v781_v48 = vsel %vm777_vm9, %v771_v27, %v779_v38  ;;  %v2572_v58 = vmul.f32 %v2481_v61, %v700_v32 }
  0xe9   : > { %v2556_v49 = vsel %vm913_vm3, %v889_v10, %v897_v39  ;;  %v2561_v53 = vsel %vm1026_vm6, %v1012_v40, %v2464_v51  ;;  %v2565_v54 = vsel %vm1026_vm6, %v1004_v15, %v1012_v40  ;;  %v786_v55 = vsel %vm2492_vm5, 0.0, %v781_v48  ;;  %v2574_v62 = vpop.f32.mrf.mxu1 }
  0xea   : > { %v939_v56 = vmul.f32 %v2477_v59, %v2556_v49  ;;  %3323 = vst [vmem:[#allocation4_spill] sm:$0xff] %v2572_v58  ;;  %vm662_vm10 = vcmp.ge.f32.partialorder %v602_v34, 0.0  ;;  %v887_v63 = vrot.slane %v786_v55, 7  ;;  %v970_v0 = vmul.f32 %v2475_v57, %v786_v55 }
  0xeb   : > { %v2579_v2 = vmul.f32 %v2497_v5, %v2565_v54  ;;  %v1052_v4 = vmul.f32 %v2497_v5, %v2561_v53  ;;  %v1002_v7 = vrot.slane %v786_v55, 1  ;;  %v2585_v9 = vmul.f32 %v2499_v6, %v2565_v54  ;;  %v2122_v12 = vpop.f32.mrf.mxu1 }
  0xec   : > { %v991_v8 = vadd.f32 %v975_v45, %v939_v56  ;;  %v682_v10 = vmul.f32 %v2469_v52, %v602_v34  ;;  %v922_v15 = vsel %vm913_vm3, %v2461_v50, %v887_v63  ;;  %v774_v17 = vadd.f32 %v2449_v43, %v773_v35 }
  0xed   : > { %vm667_vm11 = vcmp.ge.f32.partialorder %v623_v36, 0.0  ;;  %v687_v18 = vmul.f32 %v2469_v52, %v623_v36  ;;  %v934_v23 = vmul.f32 %v2477_v59, %v922_v15  ;;  %v2596_v24 = vmul.f32 %v2499_v6, %v2561_v53  ;;  %v2601_v28 = vpop.f32.mrf.mxu1 }
  0xee   : > { %v698_v25 = vsel %vm662_vm10, %v602_v34, %v682_v10  ;;  %v1150_v27 = vmul.f32 %v2489_v1, %v2556_v49  ;;  %v2603_v30 = vadd.f32 %v1052_v4, %v991_v8  ;;  %v615_v35 = vadd.f32 %v2449_v43, %v614_v11 }
  0xef   : > { %v896_v32 = vrot.slane %v698_v25, 7  ;;  %v1011_v33 = vrot.slane %v698_v25, 1  ;;  %v986_v38 = vadd.f32 %v970_v0, %v934_v23  ;;  %vm778_vm12 = vcmp.ge.f32.partialorder %v774_v17, 0.0  ;;  %v2123_v45 = vpop.f32.mrf.mxu1 }
  0xf0   : > { %v780_v39 = vmul.f32 %v2469_v52, %v774_v17  ;;  %v2607_v40 = vsel %vm667_vm11, %v623_v36, %v687_v18  ;;  %v973_v36 = vmul.f32 %v2475_v57, %v698_v25  ;;  %v1184_v16 = vmul.f32 %v2479_v60, %v698_v25 }
  0xf1   : > { %v915_v34 = vsel %vm913_vm3, %v888_v22, %v896_v32  ;;  %v1028_v47 = vsel %vm1026_vm6, %v1011_v33, %v2464_v51  ;;  %v1036_v48 = vsel %vm1026_vm6, %v1003_v26, %v1011_v33  ;;  %v891_v55 = vrot.slane %v2607_v40, 7  ;;  %v2103_v32 = vpop.f32.mrf.mxu0 }
  0xf2   : > { %v937_v56 = vmul.f32 %v2477_v59, %v915_v34  ;;  %v1049_v0 = vmul.f32 %v2497_v5, %v1036_v48  ;;  %v1050_v4 = vmul.f32 %v2497_v5, %v1028_v47  ;;  %v1148_v22 = vmul.f32 %v2489_v1, %v915_v34 }
  0xf3   : > { %v782_v8 = vsel %vm778_vm12, %v774_v17, %v780_v39  ;;  %v2630_v26 = vsel %vm913_vm3, %v2461_v50, %v891_v55  ;;  %v2633_v12 = vmul.f32 %v2499_v6, %v1036_v48  ;;  %v2638_v18 = vmul.f32 %v2499_v6, %v1028_v47 }
  0xf4   : > { %3324 = vst [vmem:[#allocation5_spill] sm:$0xff] %v2630_v26  ;;  %v989_v10 = vadd.f32 %v973_v36, %v937_v56  ;;  %v1065_v11 = vadd.f32 %v1049_v0, %v988_v41  ;;  %v787_v15 = vsel %vm2492_vm5, 0.0, %v782_v8  ;;  %v942_v25 = vmul.f32 %v2477_v59, %v2630_v26 }
  0xf5   : > { %v895_v23 = vrot.slane %v787_v15, 7  ;;  %v1010_v17 = vrot.slane %v787_v15, 1  ;;  %v971_v41 = vmul.f32 %v2475_v57, %v787_v15  ;;  %v978_v45 = vmul.f32 %v2475_v57, %v2607_v40 }
  0xf6   : > { %v1066_v33 = vadd.f32 %v1050_v4, %v989_v10  ;;  %v1165_v39 = vadd.f32 %v2530_v29, %v1065_v11  ;;  %v1006_v48 = vrot.slane %v2607_v40, 1  ;;  %v2658_v0 = vmul.f32 %v2489_v1, %v2630_v26  ;;  %v617_v10 = vpop.f32.mrf.mxu0 }
  0xf7   : > { %v914_v3 = vsel %vm913_vm3, %v887_v63, %v895_v23  ;;  %v1027_v34 = vsel %vm1026_vm6, %v1010_v17, %v2464_v51  ;;  %v1035_v47 = vsel %vm1026_vm6, %v1002_v7, %v1010_v17  ;;  %v2661_v4 = vadd.f32 %v978_v45, %v942_v25 }
  0xf8   : > { %v1166_v56 = vadd.f32 %v1150_v27, %v1066_v33  ;;  %v935_v29 = vmul.f32 %v2477_v59, %v914_v3  ;;  %v1047_v36 = vmul.f32 %v2497_v5, %v1035_v47  ;;  %v1048_v63 = vmul.f32 %v2497_v5, %v1027_v34 }
  0xf9   : > { %vm665_vm13 = vcmp.ge.f32.partialorder %v615_v35, 0.0  ;;  %v685_v8 = vmul.f32 %v2469_v52, %v615_v35  ;;  %v2666_v27 = vmul.f32 %v2479_v60, %v2607_v40  ;;  %v2670_v15 = vmul.f32 %v2481_v61, %v2607_v40 }
  0xfa   : > { %v987_v7 = vadd.f32 %v971_v41, %v935_v29  ;;  %v1063_v11 = vadd.f32 %v1047_v36, %v986_v38  ;;  %v1202_v23 = vadd.f32 %v2552_v46, %v1166_v56  ;;  %v1201_v25 = vadd.f32 %v2516_v20, %v1165_v39 }
  0xfb   : > { %3325 = vst [vmem:[#allocation6_spill] sm:$0xff] %v2670_v15  ;;  %v701_v17 = vsel %vm665_vm13, %v615_v35, %v685_v8  ;;  %v626_v33 = vadd.f32 %v2103_v32, %v2449_v43  ;;  %v618_v41 = vadd.f32 %v2449_v43, %v617_v10  ;;  %v1067_v29 = vadd.f32 %v2579_v2, %v2544_v37 }
  0xfc   : > { %v1064_v45 = vadd.f32 %v1048_v63, %v987_v7  ;;  %v2676_v3 = vadd.f32 %v2548_v44, %v1063_v11  ;;  %v890_v38 = vrot.slane %v701_v17, 7  ;;  %v976_v34 = vmul.f32 %v2475_v57, %v701_v17  ;;  %v2106_v7 = vpop.f32.mrf.mxu0 }
  0xfd   : > { %v1005_v47 = vrot.slane %v701_v17, 1  ;;  %v1277_v46 = vadd.f32 %v2585_v9, %v1201_v25  ;;  %vm668_vm14 = vcmp.ge.f32.partialorder %v626_v33, 0.0  ;;  %v688_v44 = vmul.f32 %v2469_v52, %v626_v33 }
  0xfe   : > { %v1164_v35 = vadd.f32 %v1148_v22, %v1064_v45  ;;  %v925_v20 = vsel %vm913_vm3, %v2461_v50, %v890_v38  ;;  %v1187_v56 = vmul.f32 %v2479_v60, %v701_v17  ;;  %v1398_v37 = vmul.f32 %v2481_v61, %v701_v17 }
  0xff   : > { %v940_v32 = vmul.f32 %v2477_v59, %v925_v20  ;;  %v1151_v39 = vmul.f32 %v2489_v1, %v925_v20  ;;  %v1362_v36 = vmul.f32 %v2504_v13, %v925_v20  ;;  %v704_v2 = vsel %vm668_vm14, %v626_v33, %v688_v44  ;;  %v630_v20 = vpop.f32.mrf.mxu0 }
 0x100   : > { %vm666_vm15 = vcmp.ge.f32.partialorder %v618_v41, 0.0  ;;  %v686_v9 = vmul.f32 %v2469_v52, %v618_v41  ;;  %v2693_v22 = vadd.f32 %v1184_v16, %v1164_v35  ;;  %v899_v10 = vrot.slane %v704_v2, 7 }
 0x101   : > { %v1167_v63 = vadd.f32 %v1151_v39, %v1067_v29  ;;  %v1378_v8 = vadd.f32 %v1362_v36, %v1277_v46  ;;  %v992_v11 = vadd.f32 %v976_v34, %v940_v32  ;;  %v979_v25 = vmul.f32 %v2475_v57, %v704_v2 }
 0x102   : > { %v1014_v45 = vrot.slane %v704_v2, 1  ;;  %v1278_v14 = vadd.f32 %v2596_v24, %v1202_v23  ;;  %v2701_v17 = vsel %vm913_vm3, %v891_v55, %v899_v10  ;;  %v2704_v33 = vmul.f32 %v2479_v60, %v704_v2 }
 0x103   : > { %3326 = vst [vmem:[#allocation7_spill] sm:$0xff] %v2701_v17  ;;  %v2707_v16 = vmul.f32 %v2481_v61, %v704_v2  ;;  %v702_v29 = vsel %vm666_vm15, %v618_v41, %v686_v9  ;;  %v2709_v46 = vadd.f32 %v1187_v56, %v1167_v63  ;;  %v943_v34 = vmul.f32 %v2477_v59, %v2701_v17 }
 0x104   : > { %v2716_v24 = vsel %vm1026_vm6, %v1014_v45, %v2464_v51  ;;  %v2720_v40 = vsel %vm1026_vm6, %v1006_v48, %v1014_v45  ;;  %v2722_v55 = vadd.f32 %v1398_v37, %v1378_v8  ;;  %v1154_v35 = vmul.f32 %v2489_v1, %v2701_v17 }
 0x105   : > { %3327 = vst [vmem:[#allocation8_spill] sm:$0xff] %v2707_v16  ;;  %3328 = vst [vmem:[#allocation9_spill] sm:$0xff] %v2709_v46  ;;  %v1055_v23 = vmul.f32 %v2497_v5, %v2720_v40  ;;  %v1056_v41 = vmul.f32 %v2497_v5, %v2716_v24  ;;  %v995_v44 = vadd.f32 %v979_v25, %v943_v34  ;;  %v898_v39 = vrot.slane %v702_v29, 7  ;;  %v2107_v16 = vpop.f32.mrf.mxu0 }
 0x106   : > { %3329 = vst [vmem:[#allocation10_spill] sm:$0xff] %v2716_v24  ;;  %3330 = vst [vmem:[#allocation11_spill] sm:$0xff] %v2720_v40  ;;  %v1265_v32 = vmul.f32 %v2499_v6, %v2720_v40  ;;  %v1013_v56 = vrot.slane %v702_v29, 1  ;;  %v2734_v48 = vmul.f32 %v2499_v6, %v2716_v24  ;;  %v977_v36 = vmul.f32 %v2475_v57, %v702_v29 }
 0x107   : > { %v1188_v37 = vmul.f32 %v2479_v60, %v702_v29  ;;  %v1399_v2 = vmul.f32 %v2481_v61, %v702_v29  ;;  %v917_v9 = vsel %vm913_vm3, %v890_v38, %v898_v39  ;;  %v639_v10 = vadd.f32 %v2106_v7, %v2449_v43  ;;  %v2761_v7 = vld [vmem:[%s3302_s5 + $0x8] ss:$0 sm:$0xff]  ;;  %v633_v46 = vpop.f32.mrf.mxu0 }
 0x108   : > { %v1030_v63 = vsel %vm1026_vm6, %v1013_v56, %v2464_v51  ;;  %v1038_v8 = vsel %vm1026_vm6, %v1005_v47, %v1013_v56  ;;  %v941_v25 = vmul.f32 %v2477_v59, %v917_v9  ;;  %v1152_v34 = vmul.f32 %v2489_v1, %v917_v9 }
 0x109   : > { %v1053_v45 = vmul.f32 %v2497_v5, %v1038_v8  ;;  %v631_v29 = vadd.f32 %v2449_v43, %v630_v20  ;;  %v2751_v24 = vadd.f32 %v1056_v41, %v995_v44  ;;  %v1054_v38 = vmul.f32 %v2497_v5, %v1030_v63 }
 0x10a   : > { %v2755_v39 = vmul.f32 %v2499_v6, %v1038_v8  ;;  %v1363_v47 = vmul.f32 %v2504_v13, %v917_v9  ;;  %v993_v56 = vadd.f32 %v977_v36, %v941_v25  ;;  %v1168_v15 = vadd.f32 %v1152_v34, %v2603_v30 }
 0x10b   : > { %v1069_v40 = vadd.f32 %v1053_v45, %v992_v11  ;;  %v1264_v20 = vmul.f32 %v2499_v6, %v1030_v63  ;;  %v1475_v44 = vmul.f32 %v2761_v7, %v1030_v63  ;;  %vm671_vm0 = vcmp.ge.f32.partialorder %v639_v10, 0.0 }
 0x10c   : > { %3331 = vst [vmem:[#allocation12_spill] sm:$0xff] %v2755_v39  ;;  %v1379_v41 = vadd.f32 %v1363_v47, %v1278_v14  ;;  %v691_v17 = vmul.f32 %v2469_v52, %v639_v10  ;;  %v1070_v26 = vadd.f32 %v1054_v38, %v993_v56  ;;  %v1204_v39 = vadd.f32 %v1188_v37, %v1168_v15 }
 0x10d   : > { %vm669_vm1 = vcmp.ge.f32.partialorder %v631_v29, 0.0  ;;  %v689_v9 = vmul.f32 %v2469_v52, %v631_v29  ;;  %v1169_v11 = vadd.f32 %v2658_v0, %v1069_v40  ;;  %v642_v30 = vadd.f32 %v2107_v16, %v2449_v43 }
 0x10e   : > { %v1415_v21 = vadd.f32 %v1399_v2, %v1379_v41  ;;  %v707_v58 = vsel %vm671_vm0, %v639_v10, %v691_v17  ;;  %v1170_v36 = vadd.f32 %v1154_v35, %v1070_v26  ;;  %v2771_v14 = vmul.f32 %v2761_v7, %v1038_v8 }
 0x10f   : > { %v893_v63 = vrot.slane %v707_v58, 7  ;;  %v1071_v25 = vadd.f32 %v1055_v23, %v2661_v4  ;;  %v2774_v45 = vadd.f32 %v1264_v20, %v1204_v39  ;;  %v982_v37 = vmul.f32 %v2475_v57, %v707_v58  ;;  %v2110_v4 = vpop.f32.mrf.mxu0 }
 0x110   : > { %v1491_v15 = vadd.f32 %v1475_v44, %v1415_v21  ;;  %v1008_v34 = vrot.slane %v707_v58, 1  ;;  %v2783_v0 = vmul.f32 %v2479_v60, %v707_v58  ;;  %v2786_v26 = vsel %vm669_vm1, %v631_v29, %v689_v9  ;;  %v2792_v21 = vld [vmem:[%s3303_s6] ss:$0 sm:$0xff] }
 0x111   : > { %3332 = vst [vmem:[#allocation13_spill] sm:$0xff] %v2774_v45  ;;  %v2780_v17 = vsel %vm913_vm3, %v2461_v50, %v893_v63  ;;  %v1205_v16 = vadd.f32 %v2666_v27, %v1169_v11  ;;  %3334 = vst [vmem:[#allocation15_spill] sm:$0xff] %v2792_v21  ;;  %v2797_v23 = vmul.f32 %v2481_v61, %v707_v58  ;;  %v892_v35 = vrot.slane %v2786_v26, 7  ;;  %v646_v44 = vpop.f32.mrf.mxu0 }
 0x112   : > { %3333 = vst [vmem:[#allocation14_spill] sm:$0xff] %v2780_v17  ;;  %v946_v40 = vmul.f32 %v2477_v59, %v2780_v17  ;;  %vm672_vm4 = vcmp.ge.f32.partialorder %v642_v30, 0.0  ;;  %v2801_v2 = vadd.f32 %v2792_v21, %v1491_v15  ;;  %v2805_v27 = vmul.f32 %v2489_v1, %v2780_v17 }
 0x113   : > { %3335 = vst [vmem:[#allocation16_spill] sm:$0xff] %v2797_v23  ;;  %v980_v8 = vmul.f32 %v2475_v57, %v2786_v26  ;;  %v1281_v10 = vadd.f32 %v1265_v32, %v1205_v16  ;;  %v927_v29 = vsel %vm913_vm3, %v2461_v50, %v892_v35  ;;  %v1007_v58 = vrot.slane %v2786_v26, 1 }
 0x114   : > { %3336 = vst [vmem:[#allocation17_spill] sm:$0xff] %v2801_v2  ;;  %v1191_v38 = vmul.f32 %v2479_v60, %v2786_v26  ;;  %v692_v39 = vmul.f32 %v2469_v52, %v642_v30  ;;  %v998_v47 = vadd.f32 %v982_v37, %v946_v40  ;;  %v944_v56 = vmul.f32 %v2477_v59, %v927_v29 }
 0x115   : > { %v1155_v20 = vmul.f32 %v2489_v1, %v927_v29  ;;  %v1366_v41 = vmul.f32 %v2504_v13, %v927_v29  ;;  %v1402_v32 = vmul.f32 %v2481_v61, %v2786_v26  ;;  %v634_v11 = vadd.f32 %v2449_v43, %v633_v46 }
 0x116   : > { %v708_v9 = vsel %vm672_vm4, %v642_v30, %v692_v39  ;;  %v1206_v15 = vadd.f32 %v2704_v33, %v1170_v36  ;;  %v655_v37 = vadd.f32 %v2110_v4, %v2449_v43  ;;  %v996_v40 = vadd.f32 %v980_v8, %v944_v56 }
 0x117   : > { %v1171_v16 = vadd.f32 %v1155_v20, %v1071_v25  ;;  %v1382_v23 = vadd.f32 %v1366_v41, %v1281_v10  ;;  %v901_v17 = vrot.slane %v708_v9, 7  ;;  %v983_v45 = vmul.f32 %v2475_v57, %v708_v9 }
 0x118   : > { %v1016_v2 = vrot.slane %v708_v9, 1  ;;  %v647_v29 = vadd.f32 %v2449_v43, %v646_v44  ;;  %v2833_v46 = vmul.f32 %v2479_v60, %v708_v9  ;;  %v2836_v33 = vmul.f32 %v2481_v61, %v708_v9 }
 0x119   : > { %v2826_v21 = vadd.f32 %v1191_v38, %v1171_v16  ;;  %v2830_v30 = vsel %vm913_vm3, %v893_v63, %v901_v17  ;;  %v2838_v36 = vadd.f32 %v1402_v32, %v1382_v23  ;;  %vm670_vm5 = vcmp.ge.f32.partialorder %v634_v11, 0.0 }
 0x11a   : > { %3338 = vst [vmem:[#allocation19_spill] sm:$0xff] %v2830_v30  ;;  %3339 = vst [vmem:[#allocation20_spill] sm:$0xff] %v2836_v33  ;;  %v947_v25 = vmul.f32 %v2477_v59, %v2830_v30  ;;  %v2845_v26 = vsel %vm1026_vm6, %v1016_v2, %v2464_v51  ;;  %v2849_v63 = vsel %vm1026_vm6, %v1008_v34, %v1016_v2  ;;  %v2111_v2 = vpop.f32.mrf.mxu0  ;;  %vm675_vm7 = vcmp.ge.f32.partialorder %v655_v37, 0.0 }
 0x11b   : > { %3337 = vst [vmem:[#allocation18_spill] sm:$0xff] %v2826_v21  ;;  %3340 = vst [vmem:[#allocation21_spill] sm:$0xff] %v2845_v26  ;;  %v1059_v17 = vmul.f32 %v2497_v5, %v2849_v63  ;;  %v1060_v4 = vmul.f32 %v2497_v5, %v2845_v26  ;;  %v1158_v23 = vmul.f32 %v2489_v1, %v2830_v30  ;;  %vm673_vm8 = vcmp.ge.f32.partialorder %v647_v29, 0.0 }
 0x11c   : > { %3341 = vst [vmem:[#allocation22_spill] sm:$0xff] %v2849_v63  ;;  %v999_v8 = vadd.f32 %v983_v45, %v947_v25  ;;  %v2859_v10 = vmul.f32 %v2499_v6, %v2849_v63  ;;  %v2863_v38 = vmul.f32 %v2499_v6, %v2845_v26  ;;  %v690_v34 = vmul.f32 %v2469_v52, %v634_v11 }
 0x11d   : > { %v1282_v39 = vadd.f32 %v2734_v48, %v1206_v15  ;;  %v695_v56 = vmul.f32 %v2469_v52, %v655_v37  ;;  %v693_v41 = vmul.f32 %v2469_v52, %v647_v29  ;;  %v1075_v44 = vadd.f32 %v1059_v17, %v998_v47 }
 0x11e   : > { %v2868_v20 = vadd.f32 %v1060_v4, %v999_v8  ;;  %v706_v45 = vsel %vm670_vm5, %v634_v11, %v690_v34  ;;  %v658_v16 = vadd.f32 %v2111_v2, %v2449_v43  ;;  %v831_v25 = vadd.f32 %v2449_v43, %v2574_v62 }
 0x11f   : > { %v900_v32 = vrot.slane %v706_v45, 7  ;;  %v1015_v9 = vrot.slane %v706_v45, 1  ;;  %v981_v26 = vmul.f32 %v2475_v57, %v706_v45  ;;  %v1192_v48 = vmul.f32 %v2479_v60, %v706_v45 }
 0x120   : > { %v1403_v15 = vmul.f32 %v2481_v61, %v706_v45  ;;  %v2877_v4 = vsel %vm675_vm7, %v655_v37, %v695_v56  ;;  %vm676_vm9 = vcmp.ge.f32.partialorder %v658_v16, 0.0  ;;  %v3342_v45 = vstv %s2486_s16  ;;  %s3205_s16 = scalar_lea.vmem %s3306_s9, %s2008_s25 }
 0x121   : > { %v919_v11 = vsel %vm913_vm3, %v892_v35, %v900_v32  ;;  %v2884_v47 = vsel %vm1026_vm6, %v1015_v9, %v2464_v51  ;;  %v2888_v62 = vsel %vm1026_vm6, %v1007_v58, %v1015_v9  ;;  %v1110_v17 = vrot.slane %v2877_v4, 7 }
 0x122   : > { %v945_v8 = vmul.f32 %v2477_v59, %v919_v11  ;;  %v1057_v37 = vmul.f32 %v2497_v5, %v2888_v62  ;;  %v1156_v34 = vmul.f32 %v2489_v1, %v919_v11  ;;  %v2896_v35 = vsel %vm673_vm8, %v647_v29, %v693_v41 }
 0x123   : > { %v1058_v2 = vmul.f32 %v2497_v5, %v2884_v47  ;;  %v1367_v56 = vmul.f32 %v2504_v13, %v919_v11  ;;  %v1142_v58 = vsel %vm913_vm3, %v2461_v50, %v1110_v17  ;;  %vm2906_vm10 = vcmp.eq.s32.totalorder %v3342_v45, 1 }
 0x124   : > { %v997_v9 = vadd.f32 %v981_v26, %v945_v8  ;;  %v1073_v33 = vadd.f32 %v1057_v37, %v996_v40  ;;  %v1172_v29 = vadd.f32 %v1156_v34, %v2751_v24  ;;  %v2913_v41 = vmul.f32 %v2499_v6, %v2888_v62 }
 0x125   : > { %v1268_v11 = vmul.f32 %v2499_v6, %v2884_v47  ;;  %v1383_v63 = vadd.f32 %v1367_v56, %v1282_v39  ;;  %v2918_v30 = vmul.f32 %v2489_v1, %v1142_v58  ;;  %v2922_v45 = vmul.f32 %v2479_v60, %v2877_v4 }
 0x126   : > { %v1074_v21 = vadd.f32 %v1058_v2, %v997_v9  ;;  %v1208_v26 = vadd.f32 %v1192_v48, %v1172_v29  ;;  %v1222_v40 = vrot.slane %v2877_v4, 1  ;;  %v3318_v24 = vrot.slane %v2896_v35, 7  ;;  %v649_v2 = vpop.f32.mrf.mxu0 }
 0x127   : > { %3345 = vst [vmem:[#allocation23_spill] sm:$0xff] %v2918_v30  ;;  %3346 = vst [vmem:[#allocation24_spill] sm:$0xff] %v2922_v45  ;;  %v2926_v8 = vadd.f32 %v1403_v15, %v1383_v63  ;;  %v2929_v37 = vmul.f32 %v2504_v13, %v1142_v58  ;;  %v2933_v39 = vmul.f32 %v2481_v61, %v2877_v4  ;;  %vm837_vm11 = vcmp.ge.f32.partialorder %v831_v25, 0.0 }
 0x128   : > { %v1173_v34 = vadd.f32 %v2805_v27, %v1073_v33  ;;  %v1174_v56 = vadd.f32 %v1158_v23, %v1074_v21  ;;  %v929_v48 = vsel %vm913_vm3, %v2461_v50, %v3318_v24  ;;  %v984_v63 = vmul.f32 %v2475_v57, %v2896_v35 }
 0x129   : > { %3347 = vst [vmem:[#allocation25_spill] sm:$0xff] %v2929_v37  ;;  %3348 = vst [vmem:[#allocation26_spill] sm:$0xff] %v2933_v39  ;;  %v2944_v58 = vadd.f32 %v1268_v11, %v1208_v26  ;;  %v948_v4 = vmul.f32 %v2477_v59, %v929_v48  ;;  %v1159_v9 = vmul.f32 %v2489_v1, %v929_v48 }
 0x12a   : > { %v1209_v21 = vadd.f32 %v2783_v0, %v1173_v34  ;;  %v1195_v27 = vmul.f32 %v2479_v60, %v2896_v35  ;;  %v696_v33 = vmul.f32 %v2469_v52, %v658_v16  ;;  %v839_v23 = vmul.f32 %v2469_v52, %v831_v25 }
 0x12b   : > { %v1175_v29 = vadd.f32 %v1159_v9, %v1075_v44  ;;  %v1370_v11 = vmul.f32 %v2504_v13, %v929_v48  ;;  %v650_v26 = vadd.f32 %v2449_v43, %v649_v2  ;;  %v2956_v24 = vadd.f32 %v984_v63, %v948_v4 }
 0x12c   : > { %v1285_v15 = vadd.f32 %v2859_v10, %v1209_v21  ;;  %v1406_v0 = vmul.f32 %v2481_v61, %v2896_v35  ;;  %v712_v34 = vsel %vm676_vm9, %v658_v16, %v696_v33  ;;  %v841_v45 = vsel %vm837_vm11, %v831_v25, %v839_v23 }
 0x12d   : > { %v1118_v37 = vrot.slane %v712_v34, 7  ;;  %v1210_v30 = vadd.f32 %v2833_v46, %v1174_v56  ;;  %v834_v44 = vadd.f32 %v2449_v43, %v2601_v28  ;;  %v2964_v10 = vadd.f32 %v1195_v27, %v1175_v29 }
 0x12e   : > { %v1386_v39 = vadd.f32 %v1370_v11, %v1285_v15  ;;  %v2967_v48 = vmul.f32 %v2479_v60, %v712_v34  ;;  %v1230_v63 = vrot.slane %v712_v34, 1  ;;  %v2971_v2 = vsel %vm2906_vm10, 0.0, %v841_v45 }
 0x12f   : > { %v1134_v16 = vsel %vm913_vm3, %v1110_v17, %v1118_v37  ;;  %v2976_v25 = vmul.f32 %v2481_v61, %v712_v34  ;;  %v1323_v46 = vrot.slane %v2971_v2, 7  ;;  %vm674_vm12 = vcmp.ge.f32.partialorder %v650_v26, 0.0 }
 0x130   : > { %v2979_v43 = vadd.f32 %v1406_v0, %v1386_v39  ;;  %v1162_v28 = vmul.f32 %v2489_v1, %v1134_v16  ;;  %v2985_v56 = vsel %vm1026_vm6, %v1230_v63, %v2464_v51  ;;  %v2989_v45 = vsel %vm1026_vm6, %v1222_v40, %v1230_v63 }
 0x131   : > { %v2993_v17 = vmul.f32 %v2499_v6, %v2989_v45  ;;  %v2997_v37 = vmul.f32 %v2499_v6, %v2985_v56  ;;  %v3000_v39 = vmul.f32 %v2504_v13, %v1134_v16  ;;  %v1355_v15 = vsel %vm913_vm3, %v2461_v50, %v1323_v46 }
 0x132   : > { %v3006_v4 = vmul.f32 %v2504_v13, %v1355_v15  ;;  %v1435_v40 = vrot.slane %v2971_v2, 1  ;;  %v694_v9 = vmul.f32 %v2469_v52, %v650_v26  ;;  %v1286_v21 = vadd.f32 %v2863_v38, %v1210_v30 }
 0x133   : > { %vm838_vm13 = vcmp.ge.f32.partialorder %v834_v44, 0.0  ;;  %v840_v27 = vmul.f32 %v2469_v52, %v834_v44  ;;  %v1199_v33 = vadd.f32 %v2539_v31, %v2676_v3  ;;  %v1276_v23 = vadd.f32 %v2638_v18, %v2693_v22 }
 0x134   : > { %v3017_v50 = vsel %vm674_vm12, %v650_v26, %v694_v9  ;;  %v1360_v29 = vmul.f32 %v2504_v13, %v2513_v19  ;;  %v1361_v11 = vmul.f32 %v2504_v13, %v2556_v49  ;;  %v1472_v30 = vmul.f32 %v2761_v7, %v2565_v54 }
 0x135   : > { %v902_v52 = vrot.slane %v3017_v50, 7  ;;  %v985_v31 = vmul.f32 %v2475_v57, %v3017_v50  ;;  %v1017_v3 = vrot.slane %v3017_v50, 1  ;;  %v1473_v18 = vmul.f32 %v2761_v7, %v2561_v53 }
 0x136   : > { %v1196_v22 = vmul.f32 %v2479_v60, %v3017_v50  ;;  %v842_v19 = vsel %vm838_vm13, %v834_v44, %v840_v27  ;;  %v1275_v38 = vadd.f32 %v2633_v12, %v1199_v33  ;;  %v1377_v49 = vadd.f32 %v1361_v11, %v1276_v23 }
 0x137   : > { %v3349_v26 = vrot.slane %v2896_v35, 7  ;;  %v3043_v57 = vsel %vm1026_vm6, %v1017_v3, %v2464_v51  ;;  %v1407_v53 = vmul.f32 %v2481_v61, %v3017_v50  ;;  %v847_v60 = vsel %vm2906_vm10, 0.0, %v842_v19 }
 0x138   : > { %v1062_v0 = vmul.f32 %v2497_v5, %v3043_v57  ;;  %v1490_v44 = vadd.f32 %v2771_v14, %v2722_v55  ;;  %v1272_v63 = vmul.f32 %v2499_v6, %v3043_v57  ;;  %v1331_v15 = vrot.slane %v847_v60, 7 }
 0x139   : > { %v921_v54 = vsel %vm913_vm3, %v3349_v26, %v902_v52  ;;  %v1443_v9 = vrot.slane %v847_v60, 1  ;;  %v1376_v33 = vadd.f32 %v1360_v29, %v1275_v38  ;;  %v3351_v38 = vld [vmem:[#allocation3_spill] sm:$0xff] }
 0x13a   : > { %v949_v12 = vmul.f32 %v2477_v59, %v921_v54  ;;  %v1160_v34 = vmul.f32 %v2489_v1, %v921_v54  ;;  %v1371_v16 = vmul.f32 %v2504_v13, %v921_v54  ;;  %v3350_v59 = vld [vmem:[#allocation4_spill] sm:$0xff]  ;;  %v1347_v1 = vsel %vm913_vm3, %v1323_v46, %v1331_v15 }
 0x13b   : > { %v1413_v23 = vadd.f32 %v3350_v59, %v1377_v49  ;;  %v1459_v55 = vsel %vm1026_vm6, %v1443_v9, %v2464_v51  ;;  %v3067_v14 = vsel %vm1026_vm6, %v1435_v40, %v1443_v9  ;;  %v1412_v46 = vadd.f32 %v3351_v38, %v1376_v33  ;;  %v3078_v51 = vld [vmem:[%s3303_s6 + $0x1] ss:$0 sm:$0xff] }
 0x13c   : > { %v1001_v27 = vadd.f32 %v985_v31, %v949_v12  ;;  %v1176_v32 = vadd.f32 %v1160_v34, %v2868_v20  ;;  %v1387_v11 = vadd.f32 %v1371_v16, %v1286_v21  ;;  %v1375_v31 = vmul.f32 %v2504_v13, %v1347_v1  ;;  %v3353_v12 = vld [vmem:[#allocation17_spill] sm:$0xff]  ;;  %v3357_v59 = vld [vmem:[#allocation7_spill] sm:$0xff] }
 0x13d   : > { %v1411_v20 = vmul.f32 %v2481_v61, %v847_v60  ;;  %v1487_v21 = vmul.f32 %v2761_v7, %v1459_v55  ;;  %v1489_v49 = vadd.f32 %v1473_v18, %v1413_v23  ;;  %vm1528_vm3 = vcmp.ge.f32.partialorder %v3353_v12, 0.0  ;;  %v3354_v34 = vld [vmem:[#allocation9_spill] sm:$0xff]  ;;  %v3355_v18 = vld [vmem:[#allocation12_spill] sm:$0xff] }
 0x13e   : > { %v1078_v52 = vadd.f32 %v1062_v0, %v1001_v27  ;;  %v1212_v19 = vadd.f32 %v1196_v22, %v1176_v32  ;;  %v3071_v29 = vadd.f32 %v1407_v53, %v1387_v11  ;;  %v3352_v22 = vld [vmem:[#allocation15_spill] sm:$0xff]  ;;  %v1488_v60 = vadd.f32 %v1472_v30, %v1412_v46  ;;  %v3359_v46 = vld [vmem:[#allocation6_spill] sm:$0xff] }
 0x13f   : > { %v1511_v54 = vadd.f32 %v3352_v22, %v1490_v44  ;;  %v1510_v53 = vadd.f32 %v3352_v22, %v1489_v49  ;;  %v1549_v0 = vmul.f32 %v3078_v51, %v3353_v12  ;;  %v1279_v16 = vadd.f32 %v3355_v18, %v3354_v34 }
 0x140   : > { %v1178_v40 = vadd.f32 %v1162_v28, %v1078_v52  ;;  %v3080_v26 = vadd.f32 %v1272_v63, %v1212_v19  ;;  %v3356_v63 = vld [vmem:[#allocation5_spill] sm:$0xff]  ;;  %v1509_v44 = vadd.f32 %v3352_v22, %v1488_v60  ;;  %v1365_v23 = vmul.f32 %v2504_v13, %v3357_v59 }
 0x141   : > { %vm1527_vm14 = vcmp.ge.f32.partialorder %v1511_v54, 0.0  ;;  %v1548_v28 = vmul.f32 %v3078_v51, %v1511_v54  ;;  %v1364_v9 = vmul.f32 %v2504_v13, %v3356_v63  ;;  %vm1526_vm15 = vcmp.ge.f32.partialorder %v1510_v53, 0.0  ;;  %v3358_v19 = vld [vmem:[#allocation13_spill] sm:$0xff] }
 0x142   : > { %v1214_v15 = vadd.f32 %v2967_v48, %v1178_v40  ;;  %v1547_v30 = vmul.f32 %v3078_v51, %v1510_v53  ;;  %v1565_v27 = vsel %vm1528_vm3, %v3353_v12, %v1549_v0  ;;  %vm1525_vm0 = vcmp.ge.f32.partialorder %v1509_v44, 0.0  ;;  %v3360_v40 = vld [vmem:[#allocation11_spill] sm:$0xff] }
 0x143   : > { %v1564_v33 = vsel %vm1527_vm14, %v1511_v54, %v1548_v28  ;;  %v1380_v48 = vadd.f32 %v1364_v9, %v1279_v16  ;;  %v1546_v11 = vmul.f32 %v3078_v51, %v1509_v44  ;;  %v1381_v38 = vadd.f32 %v1365_v23, %v3358_v19  ;;  %v3363_v9 = vld [vmem:[#allocation18_spill] sm:$0xff]  ;;  %v3367_v19 = vld [vmem:[#allocation16_spill] sm:$0xff] }
 0x144   : > { %v1290_v32 = vadd.f32 %v2997_v37, %v1214_v15  ;;  %v1563_v1 = vsel %vm1526_vm15, %v1510_v53, %v1547_v30  ;;  %v1579_v55 = vpack.c.bf16 %v1565_v27, %v1564_v33  ;;  %v1476_v12 = vmul.f32 %v2761_v7, %v3360_v40  ;;  %v3361_v37 = vld [vmem:[#allocation10_spill] sm:$0xff]  ;;  %v3368_v40 = vld [vmem:[#allocation20_spill] sm:$0xff] }
 0x145   : > { %v1416_v49 = vadd.f32 %v3359_v46, %v1380_v48  ;;  %v1562_v60 = vsel %vm1525_vm0, %v1509_v44, %v1546_v11  ;;  %v1477_v54 = vmul.f32 %v2761_v7, %v3361_v37  ;;  %v1478_v0 = vmul.f32 %v2761_v7, %v2888_v62  ;;  %v3364_v30 = vld [vmem:[#allocation14_spill] sm:$0xff] }
 0x146   : > { %v1391_v52 = vadd.f32 %v1375_v31, %v1290_v32  ;;  %v1479_v34 = vmul.f32 %v2761_v7, %v2884_v47  ;;  %v1578_v18 = vpack.c.bf16 %v1563_v1, %v1562_v60  ;;  %v3362_v31 = vld [vmem:[#allocation8_spill] sm:$0xff]  ;;  %v1283_v44 = vadd.f32 %v2913_v41, %v3363_v9  ;;  %v3366_v23 = vld [vmem:[#allocation22_spill] sm:$0xff]  ;;  %v3369_v60 = vld [vmem:[#allocation21_spill] sm:$0xff] }
 0x147   : > { %v1417_v16 = vadd.f32 %v3362_v31, %v1381_v38  ;;  %v1492_v15 = vadd.f32 %v1476_v12, %v1416_v49  ;;  %v1494_v28 = vadd.f32 %v1478_v0, %v2838_v36  ;;  %v1368_v27 = vmul.f32 %v2504_v13, %v3364_v30 }
 0x148   : > { %v1427_v53 = vadd.f32 %v1411_v20, %v1391_v52  ;;  %v1495_v63 = vadd.f32 %v1479_v34, %v2926_v8  ;;  %2140 = vmatprep.mubr.bf16.mxu0 %v1578_v18  ;;  %v3365_v20 = vld [vmem:[#allocation19_spill] sm:$0xff]  ;;  %v1480_v41 = vmul.f32 %v2761_v7, %v3366_v23  ;;  %v1481_v37 = vmul.f32 %v2761_v7, %v3369_v60 }
 0x149   : > { %v1493_v62 = vadd.f32 %v1477_v54, %v1417_v16  ;;  %v1513_v47 = vadd.f32 %v3352_v22, %v1492_v15  ;;  %v1369_v33 = vmul.f32 %v2504_v13, %v3365_v20  ;;  %2141 = vmatmul.mubr.bf16.vlgmr.msra.gmra.mxu0 %v1579_v55  ;;  %v1515_v36 = vadd.f32 %v3352_v22, %v1494_v28 }
 0x14a   : > { %v3117_v32 = vadd.f32 %v1487_v21, %v1427_v53  ;;  %v1516_v8 = vadd.f32 %v3352_v22, %v1495_v63  ;;  %v1384_v59 = vadd.f32 %v1368_v27, %v1283_v44  ;;  %v3370_v34 = vrot.slane %v2896_v35, 1  ;;  %v3372_v27 = vld [vmem:[#allocation25_spill] sm:$0xff] }
 0x14b   : > { %v1514_v48 = vadd.f32 %v3352_v22, %v1493_v62  ;;  %vm1529_vm1 = vcmp.ge.f32.partialorder %v1513_v47, 0.0  ;;  %v1550_v21 = vmul.f32 %v3078_v51, %v1513_v47  ;;  %v1385_v11 = vadd.f32 %v1369_v33, %v2944_v58  ;;  %v3373_v33 = vld [vmem:[#allocation26_spill] sm:$0xff] }
 0x14c   : > { %vm1531_vm4 = vcmp.ge.f32.partialorder %v1515_v36, 0.0  ;;  %vm1532_vm5 = vcmp.ge.f32.partialorder %v1516_v8, 0.0  ;;  %v1552_v13 = vmul.f32 %v3078_v51, %v1515_v36  ;;  %v1553_v1 = vmul.f32 %v3078_v51, %v1516_v8 }
 0x14d   : > { %vm1530_vm7 = vcmp.ge.f32.partialorder %v1514_v48, 0.0  ;;  %v1551_v55 = vmul.f32 %v3078_v51, %v1514_v48  ;;  %v1566_v52 = vsel %vm1529_vm1, %v1513_v47, %v1550_v21  ;;  %v1420_v38 = vadd.f32 %v3367_v19, %v1384_v59 }
 0x14e   : > { %v1568_v46 = vsel %vm1531_vm4, %v1515_v36, %v1552_v13  ;;  %v1569_v49 = vsel %vm1532_vm5, %v1516_v8, %v1553_v1  ;;  %v1421_v12 = vadd.f32 %v3368_v40, %v1385_v11  ;;  %v1042_v53 = vsel %vm1026_vm6, %v3370_v34, %v1017_v3  ;;  %v1754_v34 = vld [vmem:[%s2376_s29 + $0x10] sm:$0xff] }
 0x14f   : > { %v1567_v58 = vsel %vm1530_vm7, %v1514_v48, %v1551_v55  ;;  %v1581_v54 = vpack.c.bf16 %v1569_v49, %v1568_v46  ;;  %v1496_v0 = vadd.f32 %v1480_v41, %v1420_v38  ;;  %v1061_v16 = vmul.f32 %v2497_v5, %v1042_v53 }
 0x150   : > { %v1580_v18 = vpack.c.bf16 %v1567_v58, %v1566_v52  ;;  %v1497_v31 = vadd.f32 %v1481_v37, %v1421_v12  ;;  %v1271_v15 = vmul.f32 %v2499_v6, %v1042_v53  ;;  %v1482_v63 = vmul.f32 %v2761_v7, %v1042_v53 }
 0x151   : > { %v1517_v28 = vadd.f32 %v3352_v22, %v1496_v0  ;;  %v1483_v9 = vmul.f32 %v2761_v7, %v3043_v57  ;;  %v1389_v50 = vadd.f32 %v3000_v39, %v3080_v26  ;;  %v1077_v35 = vadd.f32 %v1061_v16, %v2956_v24  ;;  %v3371_v26 = vld [vmem:[#allocation23_spill] sm:$0xff] }
 0x152   : > { %2144 = vmatprep.mubr.bf16.mxu0 %v1580_v18  ;;  %v1518_v42 = vadd.f32 %v3352_v22, %v1497_v31  ;;  %v1287_v3 = vadd.f32 %v1271_v15, %v2964_v10  ;;  %v1484_v5 = vmul.f32 %v2761_v7, %v2989_v45  ;;  %v1498_v44 = vadd.f32 %v1482_v63, %v2979_v43  ;;  %v1752_v18 = vld [vmem:[%s2376_s29] sm:$0xff] }
 0x153   : > { %2145 = vmatmul.mubr.bf16.gmra.mxu0 %v1581_v54  ;;  %vm1533_vm6 = vcmp.ge.f32.partialorder %v1517_v28, 0.0  ;;  %v1554_v6 = vmul.f32 %v3078_v51, %v1517_v28  ;;  %v1499_v57 = vadd.f32 %v1483_v9, %v3071_v29  ;;  %v1177_v30 = vadd.f32 %v3371_v26, %v1077_v35  ;;  %v3374_v29 = vld [vmem:[#allocation24_spill] sm:$0xff]  ;;  %v3188_v54 = vld [vmem:[%s3305_s8] ss:$0 sm:$0xff] }
 0x154   : > { %vm1534_vm8 = vcmp.ge.f32.partialorder %v1518_v42, 0.0  ;;  %v1555_v39 = vmul.f32 %v3078_v51, %v1518_v42  ;;  %v1388_v24 = vadd.f32 %v3372_v27, %v1287_v3  ;;  %v1519_v10 = vadd.f32 %v3352_v22, %v1498_v44 }
 0x155   : > { %v1570_v62 = vsel %vm1533_vm6, %v1517_v28, %v1554_v6  ;;  %v1520_v45 = vadd.f32 %v3352_v22, %v1499_v57  ;;  %v1425_v47 = vadd.f32 %v2976_v25, %v1389_v50  ;;  %v1485_v43 = vmul.f32 %v2761_v7, %v2985_v56  ;;  %v1755_v28 = vld [vmem:[%s2376_s29 + $0x18] sm:$0xff]  ;;  %v1753_v6 = vld [vmem:[%s2376_s29 + $0x8] sm:$0xff] }
 0x156   : > { %v1571_v20 = vsel %vm1534_vm8, %v1518_v42, %v1555_v39  ;;  %v1424_v36 = vadd.f32 %v3373_v33, %v1388_v24  ;;  %v1213_v8 = vadd.f32 %v3374_v29, %v1177_v30  ;;  %vm1535_vm9 = vcmp.ge.f32.partialorder %v1519_v10, 0.0  ;;  %v1758_v30 = vld [vmem:[%s2376_s29 + $0x30] sm:$0xff] }
 0x157   : > { %v1582_v59 = vpack.c.bf16 %v1571_v20, %v1570_v62  ;;  %vm1536_vm10 = vcmp.ge.f32.partialorder %v1520_v45, 0.0  ;;  %v1556_v23 = vmul.f32 %v3078_v51, %v1519_v10  ;;  %v1557_v41 = vmul.f32 %v3078_v51, %v1520_v45 }
 0x158   : > { %v1500_v48 = vadd.f32 %v1484_v5, %v1424_v36  ;;  %v1501_v21 = vadd.f32 %v1485_v43, %v1425_v47  ;;  %v1289_v11 = vadd.f32 %v2993_v17, %v1213_v8  ;;  %v1410_v52 = vmul.f32 %v2481_v61, %v2971_v2 }
 0x159   : > { %2148 = vmatprep.mubr.bf16.mxu0 %v1582_v59  ;;  %v1572_v25 = vsel %vm1535_vm9, %v1519_v10, %v1556_v23  ;;  %v1573_v13 = vsel %vm1536_vm10, %v1520_v45, %v1557_v41  ;;  %v1524_v38 = vadd.f32 %v3352_v22, %v3117_v32  ;;  %v1486_v49 = vmul.f32 %v2761_v7, %v3067_v14  ;;  %v1756_v45 = vld [vmem:[%s2376_s29 + $0x20] sm:$0xff]  ;;  %v1759_v59 = vld [vmem:[%s2376_s29 + $0x38] sm:$0xff] }
 0x15a   : > { %v1521_v1 = vadd.f32 %v3352_v22, %v1500_v48  ;;  %v1522_v56 = vadd.f32 %v3352_v22, %v1501_v21  ;;  %v1390_v55 = vadd.f32 %v3006_v4, %v1289_v11  ;;  %v1583_v19 = vpack.c.bf16 %v1573_v13, %v1572_v25  ;;  %v1757_v48 = vld [vmem:[%s2376_s29 + $0x28] sm:$0xff] }
 0x15b   : > { %v1561_v2 = vmul.f32 %v3078_v51, %v1524_v38  ;;  %vm1540_vm13 = vcmp.ge.f32.partialorder %v1524_v38, 0.0 }
 0x15c   : > { %vm1537_vm11 = vcmp.ge.f32.partialorder %v1521_v1, 0.0  ;;  %vm1538_vm12 = vcmp.ge.f32.partialorder %v1522_v56, 0.0  ;;  %v1558_v17 = vmul.f32 %v3078_v51, %v1521_v1  ;;  %v1559_v46 = vmul.f32 %v3078_v51, %v1522_v56  ;;  %2149 = vmatmul.mubr.bf16.gmra.mxu0 %v1583_v19  ;;  %v1762_v19 = vld [vmem:[%s2376_s29 + $0x50] sm:$0xff] }
 0x15d   : > { %v1426_v40 = vadd.f32 %v1410_v52, %v1390_v55  ;;  %v1577_v7 = vsel %vm1540_vm13, %v1524_v38, %v1561_v2  ;;  %v1763_v2 = vld [vmem:[%s2376_s29 + $0x58] sm:$0xff] }
 0x15e   : > { %v1574_v12 = vsel %vm1537_vm11, %v1521_v1, %v1558_v17  ;;  %v1575_v4 = vsel %vm1538_vm12, %v1522_v56, %v1559_v46 }
 0x15f   : > { %v1584_v60 = vpack.c.bf16 %v1575_v4, %v1574_v12  ;;  %v1502_v61 = vadd.f32 %v1486_v49, %v1426_v40  ;;  %v1760_v40 = vld [vmem:[%s2376_s29 + $0x40] sm:$0xff] }
 0x161   : > { %2152 = vmatprep.mubr.bf16.mxu1 %v1584_v60  ;;  %v1523_v32 = vadd.f32 %v3352_v22, %v1502_v61  ;;  %v3195_v22 = vld [vmem:[%s3305_s8 + $0x1] ss:$0 sm:$0xff] }
 0x163   : > { %vm1539_vm3 = vcmp.ge.f32.partialorder %v1523_v32, 0.0  ;;  %v1560_v37 = vmul.f32 %v3078_v51, %v1523_v32 }
 0x165   : > { %v1576_v14 = vsel %vm1539_vm3, %v1523_v32, %v1560_v37 }
 0x166   : > { %v1585_v58 = vpack.c.bf16 %v1577_v7, %v1576_v14 }
 0x168   : > { %2153 = vmatmul.mubr.bf16.vlgmr.msra.gmra.mxu1 %v1585_v58 }
 0x209   : > { %v2142_v0 = vpop.f32.mrf.mxu0 }
 0x20a   : > { %v1698_v53 = vadd.f32 %v2142_v0, %v3188_v54 }
 0x20b   : > { %v1689_v51 = vpop.f32.mrf.mxu0 }
 0x20c   : > { %v1770_v31 = vadd.f32 %v1754_v34, %v1698_v53  ;;  %v1690_v16 = vadd.f32 %v3188_v54, %v1689_v51  ;;  %v1761_v53 = vld [vmem:[%s2376_s29 + $0x48] sm:$0xff] }
 0x20d   : > { %v2143_v15 = vpop.f32.mrf.mxu0 }
 0x20e   : > { %vm1786_vm14 = vcmp.ge.f32.partialorder %v1770_v31, 0.0  ;;  %v1807_v63 = vmul.f32 %v3195_v22, %v1770_v31  ;;  %v1768_v9 = vadd.f32 %v1752_v18, %v1690_v16  ;;  %v1701_v50 = vadd.f32 %v2143_v15, %v3188_v54 }
 0x20f   : > { %v1692_v42 = vpop.f32.mrf.mxu0 }
 0x210   : > { %v1823_v35 = vsel %vm1786_vm14, %v1770_v31, %v1807_v63  ;;  %vm1784_vm15 = vcmp.ge.f32.partialorder %v1768_v9, 0.0  ;;  %v1805_v3 = vmul.f32 %v3195_v22, %v1768_v9  ;;  %v1771_v5 = vadd.f32 %v1755_v28, %v1701_v50  ;;  %v1766_v63 = vld [vmem:[%s2376_s29 + $0x70] sm:$0xff] }
 0x211   : > { %1839 = vst.msk [vmem:[%s3205_s16 + $0x10] sm:$0xff] %vm535_vm2, %v1823_v35  ;;  %v1693_v44 = vadd.f32 %v3188_v54, %v1692_v42  ;;  %v1764_v35 = vld [vmem:[%s2376_s29 + $0x60] sm:$0xff] }
 0x212   : > { %v1821_v57 = vsel %vm1784_vm15, %v1768_v9, %v1805_v3  ;;  %vm1787_vm0 = vcmp.ge.f32.partialorder %v1771_v5, 0.0  ;;  %v1808_v39 = vmul.f32 %v3195_v22, %v1771_v5 }
 0x213   : > { %v2146_v26 = vpop.f32.mrf.mxu0  ;;  %1837 = vst.msk [vmem:[%s3205_s16] sm:$0xff] %vm535_vm2, %v1821_v57  ;;  %v1769_v27 = vadd.f32 %v1753_v6, %v1693_v44  ;;  %v1767_v57 = vld [vmem:[%s2376_s29 + $0x78] sm:$0xff] }
 0x214   : > { %v1714_v24 = vadd.f32 %v2146_v26, %v3188_v54  ;;  %v1824_v62 = vsel %vm1787_vm0, %v1771_v5, %v1808_v39 }
 0x215   : > { %v1705_v10 = vpop.f32.mrf.mxu0  ;;  %1840 = vst.msk [vmem:[%s3205_s16 + $0x18] sm:$0xff] %vm535_vm2, %v1824_v62  ;;  %vm1785_vm1 = vcmp.ge.f32.partialorder %v1769_v27, 0.0  ;;  %v1806_v47 = vmul.f32 %v3195_v22, %v1769_v27 }
 0x216   : > { %v1774_v20 = vadd.f32 %v1758_v30, %v1714_v24  ;;  %v1706_v33 = vadd.f32 %v3188_v54, %v1705_v10 }
 0x217   : > { %v2147_v36 = vpop.f32.mrf.mxu0  ;;  %v1822_v43 = vsel %vm1785_vm1, %v1769_v27, %v1806_v47 }
 0x218   : > { %vm1790_vm4 = vcmp.ge.f32.partialorder %v1774_v20, 0.0  ;;  %v1811_v29 = vmul.f32 %v3195_v22, %v1774_v20  ;;  %v1772_v8 = vadd.f32 %v1756_v45, %v1706_v33  ;;  %1838 = vst.msk [vmem:[%s3205_s16 + $0x8] sm:$0xff] %vm535_vm2, %v1822_v43  ;;  %v1717_v23 = vadd.f32 %v2147_v36, %v3188_v54  ;;  %v1765_v45 = vld [vmem:[%s2376_s29 + $0x68] sm:$0xff] }
 0x219   : > { %v1708_v41 = vpop.f32.mrf.mxu0 }
 0x21a   : > { %v1827_v21 = vsel %vm1790_vm4, %v1774_v20, %v1811_v29  ;;  %vm1788_vm5 = vcmp.ge.f32.partialorder %v1772_v8, 0.0  ;;  %v1809_v11 = vmul.f32 %v3195_v22, %v1772_v8  ;;  %v1709_v25 = vadd.f32 %v3188_v54, %v1708_v41 }
 0x21b   : > { %1843 = vst.msk [vmem:[%s3205_s16 + $0x30] sm:$0xff] %vm535_vm2, %v1827_v21  ;;  %v1775_v13 = vadd.f32 %v1759_v59, %v1717_v23 }
 0x21c   : > { %v1825_v1 = vsel %vm1788_vm5, %v1772_v8, %v1809_v11  ;;  %v1773_v56 = vadd.f32 %v1757_v48, %v1709_v25  ;;  %v2150_v52 = vpop.f32.mrf.mxu0 }
 0x21d   : > { %1841 = vst.msk [vmem:[%s3205_s16 + $0x20] sm:$0xff] %vm535_vm2, %v1825_v1  ;;  %vm1791_vm7 = vcmp.ge.f32.partialorder %v1775_v13, 0.0  ;;  %v1812_v55 = vmul.f32 %v3195_v22, %v1775_v13  ;;  %v1730_v17 = vadd.f32 %v2150_v52, %v3188_v54 }
 0x21e   : > { %vm1789_vm6 = vcmp.ge.f32.partialorder %v1773_v56, 0.0  ;;  %v1810_v38 = vmul.f32 %v3195_v22, %v1773_v56  ;;  %v1721_v49 = vpop.f32.mrf.mxu0 }
 0x21f   : > { %v1828_v46 = vsel %vm1791_vm7, %v1775_v13, %v1812_v55  ;;  %v1778_v4 = vadd.f32 %v1762_v19, %v1730_v17  ;;  %v1722_v60 = vadd.f32 %v3188_v54, %v1721_v49 }
 0x220   : > { %1844 = vst.msk [vmem:[%s3205_s16 + $0x38] sm:$0xff] %vm535_vm2, %v1828_v46  ;;  %v1826_v12 = vsel %vm1789_vm6, %v1773_v56, %v1810_v38  ;;  %v2151_v61 = vpop.f32.mrf.mxu0 }
 0x221   : > { %1842 = vst.msk [vmem:[%s3205_s16 + $0x28] sm:$0xff] %vm535_vm2, %v1826_v12  ;;  %vm1794_vm8 = vcmp.ge.f32.partialorder %v1778_v4, 0.0  ;;  %v1815_v32 = vmul.f32 %v3195_v22, %v1778_v4  ;;  %v1776_v37 = vadd.f32 %v1760_v40, %v1722_v60  ;;  %v1733_v7 = vadd.f32 %v2151_v61, %v3188_v54 }
 0x222   : > { %v1724_v14 = vpop.f32.mrf.mxu0 }
 0x223   : > { %v1831_v58 = vsel %vm1794_vm8, %v1778_v4, %v1815_v32  ;;  %vm1792_vm9 = vcmp.ge.f32.partialorder %v1776_v37, 0.0  ;;  %v1813_v0 = vmul.f32 %v3195_v22, %v1776_v37  ;;  %v1779_v34 = vadd.f32 %v1763_v2, %v1733_v7 }
 0x224   : > { %1847 = vst.msk [vmem:[%s3205_s16 + $0x50] sm:$0xff] %vm535_vm2, %v1831_v58  ;;  %v1725_v51 = vadd.f32 %v3188_v54, %v1724_v14 }
 0x225   : > { %v1829_v18 = vsel %vm1792_vm9, %v1776_v37, %v1813_v0  ;;  %vm1795_vm10 = vcmp.ge.f32.partialorder %v1779_v34, 0.0  ;;  %v1816_v31 = vmul.f32 %v3195_v22, %v1779_v34 }
 0x226   : > { %1845 = vst.msk [vmem:[%s3205_s16 + $0x40] sm:$0xff] %vm535_vm2, %v1829_v18  ;;  %v1777_v16 = vadd.f32 %v1761_v53, %v1725_v51 }
 0x227   : > { %v1832_v15 = vsel %vm1795_vm10, %v1779_v34, %v1816_v31 }
 0x228   : > { %v2154_v28 = vpop.f32.mrf.mxu1  ;;  %1848 = vst.msk [vmem:[%s3205_s16 + $0x58] sm:$0xff] %vm535_vm2, %v1832_v15  ;;  %vm1793_vm11 = vcmp.ge.f32.partialorder %v1777_v16, 0.0  ;;  %v1814_v9 = vmul.f32 %v3195_v22, %v1777_v16 }
 0x229   : > { %v1746_v50 = vadd.f32 %v2154_v28, %v3188_v54 }
 0x22a   : > { %v1737_v42 = vpop.f32.mrf.mxu1  ;;  %v1830_v3 = vsel %vm1793_vm11, %v1777_v16, %v1814_v9 }
 0x22b   : > { %v1782_v5 = vadd.f32 %v1766_v63, %v1746_v50  ;;  %v1738_v6 = vadd.f32 %v3188_v54, %v1737_v42  ;;  %1846 = vst.msk [vmem:[%s3205_s16 + $0x48] sm:$0xff] %vm535_vm2, %v1830_v3 }
 0x22c   : > { %v2155_v44 = vpop.f32.mrf.mxu1 }
 0x22d   : > { %vm1798_vm12 = vcmp.ge.f32.partialorder %v1782_v5, 0.0  ;;  %v1819_v39 = vmul.f32 %v3195_v22, %v1782_v5  ;;  %v1780_v26 = vadd.f32 %v1764_v35, %v1738_v6  ;;  %v1749_v30 = vadd.f32 %v2155_v44, %v3188_v54 }
 0x22e   : > { %v1740_v27 = vpop.f32.mrf.mxu1 }
 0x22f   : > { %v1835_v24 = vsel %vm1798_vm12, %v1782_v5, %v1819_v39  ;;  %vm1796_vm13 = vcmp.ge.f32.partialorder %v1780_v26, 0.0  ;;  %v1817_v62 = vmul.f32 %v3195_v22, %v1780_v26  ;;  %v1783_v10 = vadd.f32 %v1767_v57, %v1749_v30 }
 0x230   : > { %1851 = vst.msk [vmem:[%s3205_s16 + $0x70] sm:$0xff] %vm535_vm2, %v1835_v24  ;;  %v1741_v47 = vadd.f32 %v3188_v54, %v1740_v27 }
 0x231   : > { %v1833_v20 = vsel %vm1796_vm13, %v1780_v26, %v1817_v62  ;;  %vm1799_vm3 = vcmp.ge.f32.partialorder %v1783_v10, 0.0  ;;  %v1820_v33 = vmul.f32 %v3195_v22, %v1783_v10 }
 0x232   : > { %1849 = vst.msk [vmem:[%s3205_s16 + $0x60] sm:$0xff] %vm535_vm2, %v1833_v20  ;;  %v1781_v36 = vadd.f32 %v1765_v45, %v1741_v47 }
 0x233   : > { %v1836_v43 = vsel %vm1799_vm3, %v1783_v10, %v1820_v33 }
 0x234   : > { %1852 = vst.msk [vmem:[%s3205_s16 + $0x78] sm:$0xff] %vm535_vm2, %v1836_v43  ;;  %vm1797_vm14 = vcmp.ge.f32.partialorder %v1781_v36, 0.0  ;;  %v1818_v29 = vmul.f32 %v3195_v22, %v1781_v36 }
 0x236   : > { %v1834_v8 = vsel %vm1797_vm14, %v1781_v36, %v1818_v29 }
 0x237   : > { %1850 = vst.msk [vmem:[%s3205_s16 + $0x68] sm:$0xff] %vm535_vm2, %v1834_v8 }
 0x238 PF: > { %s19_s13 = sadd.s32 1, %s2261_s13   ;;  %s3375_s30 = smov %s2253_s11 }
 0x239   : > { %p16_p12 = scmp.ge.s32.totalorder %s19_s13, 6   ;;  %s3376_s10 = smov %s2257_s12 }
 0x23a   : > { %s3377_s11 = smov %s3380_s14  ;;  %s3378_s12 = smov %s3384_s15 }
 0x23b   :  { %18 = sbr.rel (!%p16_p12) target bundleno = 3 (0x3), region = 95 }

</bundles_post_ra>
